<compile_context>
chip_gen: v7x
topology: tpu7x:2x2x1
jax: 0.10.0
libtpu: 0.0.40
codegen_flags: <defaults>
</compile_context>

<pallas_src>
import functools
import math

import jax
import jax.numpy as jnp
from jax.experimental import pallas as pl
from jax.experimental.pallas import tpu as pltpu


# ----------------------------------------------------------------------------
# Fused encoder kernel: one invocation = one (batch element, layer) grid step.
# ----------------------------------------------------------------------------
def _encoder_kernel(x_ref, allowed_ref, emb_g_ref, emb_b_ref,
                    wqkv_ref, bqkv_ref, wo_ref, bo_ref,
                    ln1g_ref, ln1b_ref, w1_ref, b1_ref, w2_ref, b2_ref,
                    ln2g_ref, ln2b_ref, o_ref, x_scr,
                    *, num_heads, eps):
    layer = pl.program_id(1)
    n_layers = pl.num_programs(1)
    s, h = x_scr.shape
    dh = h // num_heads

    def mm(a, w):
        # MXU matmul: bf16 inputs, f32 accumulation (weights stored bf16).
        return jnp.dot(a.astype(jnp.bfloat16), w,
                       preferred_element_type=jnp.float32)

    def layer_norm(v, g, b):
        mu = jnp.mean(v, axis=-1, keepdims=True)
        var = jnp.mean((v - mu) ** 2, axis=-1, keepdims=True)
        return (v - mu) * jax.lax.rsqrt(var + eps) * g + b

    # --- layer 0: embedding LayerNorm, (re)initialize the activation scratch
    @pl.when(layer == 0)
    def _():
        x_scr[...] = layer_norm(x_ref[0], emb_g_ref[...], emb_b_ref[...])

    x = x_scr[...]                                            # (S, H) f32

    # additive attention bias from int8 visible/padding matrix (in-kernel,
    # 4x less HBM traffic than a precomputed f32 bias; VPU work is free).
    bias = (1.0 - allowed_ref[0].astype(jnp.float32)) * (-10000.0)   # (S, S)

    # --- fused Q|K|V projection: one (S,H) @ (H,3H) matmul ---------------
    # (1/sqrt(dh) softmax scale is pre-folded into the Q columns of wqkv.)
    qkv = mm(x, wqkv_ref[0]) + bqkv_ref[0]                    # (S, 3H) f32

    # batched per-head layout (nh, S, dh): one reshape+transpose, no per-head
    # Python loop, no concatenate.
    def to_heads(t):
        return jnp.swapaxes(t.reshape(s, num_heads, dh), 0, 1)

    qh = to_heads(qkv[:, :h]).astype(jnp.bfloat16)            # (nh, S, dh)
    kh = to_heads(qkv[:, h:2 * h]).astype(jnp.bfloat16)
    vh = to_heads(qkv[:, 2 * h:]).astype(jnp.bfloat16)

    # --- visible-matrix masked attention, all heads in one batched matmul ---
    sc = jax.lax.dot_general(qh, kh, (((2,), (2,)), ((0,), (0,))),
                             preferred_element_type=jnp.float32)  # (nh, S, S)
    sc = sc + bias[None, :, :]                                # broadcast once
    m = jnp.max(sc, axis=-1, keepdims=True)
    p = jnp.exp(sc - m)
    p = p * pl.reciprocal(jnp.sum(p, axis=-1, keepdims=True), approx=True)

    ctx = jax.lax.dot_general(p.astype(jnp.bfloat16), vh,
                              (((2,), (1,)), ((0,), (0,))),
                              preferred_element_type=jnp.float32)  # (nh, S, dh)

    # head-concat + Wo folded into one batched matmul + head-sum:
    #   ctx @ Wo == sum_h ctx_h @ Wo[h]   with Wo stored (nh, dh, H).
    attn = jax.lax.dot_general(ctx.astype(jnp.bfloat16), wo_ref[0],
                               (((2,), (1,)), ((0,), (0,))),
                               preferred_element_type=jnp.float32)  # (nh, S, H)
    attn_out = jnp.sum(attn, axis=0) + bo_ref[0]              # (S, H)

    # --- residual + LayerNorm ---
    x = layer_norm(x + attn_out, ln1g_ref[0], ln1b_ref[0])

    # --- feed-forward + residual + LayerNorm ---
    # (tanh-approx GELU; HF roberta default is erf-GELU — diff ~1e-3)
    ff = jax.nn.gelu(mm(x, w1_ref[0]) + b1_ref[0], approximate=True)
    ff = mm(ff, w2_ref[0]) + b2_ref[0]
    x = layer_norm(x + ff, ln2g_ref[0], ln2b_ref[0])

    x_scr[...] = x                                            # carry to next layer

    @pl.when(layer == n_layers - 1)
    def _():
        o_ref[0] = x.astype(o_ref.dtype)                      # bf16 output


def encoder_forward(params, cfg, x_emb, allowed):
    """x_emb: (B,S,H) f32 summed embeddings; allowed: (B,S,S) int8 vm*mask."""
    b, s, h = x_emb.shape
    L, nh, inter = cfg.num_layers, cfg.num_heads, cfg.intermediate_size
    dh = h // nh

    in_specs = [
        # per-batch activations / mask: revisit same block across the layer axis
        pl.BlockSpec((1, s, h), lambda bi, l: (bi, 0, 0)),         # x_emb
        pl.BlockSpec((1, s, s), lambda bi, l: (bi, 0, 0)),         # allowed (int8)
        # grid-invariant embedding LayerNorm params (tiny)
        pl.BlockSpec((1, h), lambda bi, l: (0, 0)),                # emb_ln_g
        pl.BlockSpec((1, h), lambda bi, l: (0, 0)),                # emb_ln_b
        # per-layer weights: only one layer resident, next layer prefetched
        pl.BlockSpec((1, h, 3 * h), lambda bi, l: (l, 0, 0)),      # wqkv
        pl.BlockSpec((1, 1, 3 * h), lambda bi, l: (l, 0, 0)),      # bqkv
        pl.BlockSpec((1, nh, dh, h), lambda bi, l: (l, 0, 0, 0)),  # wo (per-head)
        pl.BlockSpec((1, 1, h), lambda bi, l: (l, 0, 0)),          # bo
        pl.BlockSpec((1, 1, h), lambda bi, l: (l, 0, 0)),          # ln1_g
        pl.BlockSpec((1, 1, h), lambda bi, l: (l, 0, 0)),          # ln1_b
        pl.BlockSpec((1, h, inter), lambda bi, l: (l, 0, 0)),      # w1
        pl.BlockSpec((1, 1, inter), lambda bi, l: (l, 0, 0)),      # b1
        pl.BlockSpec((1, inter, h), lambda bi, l: (l, 0, 0)),      # w2
        pl.BlockSpec((1, 1, h), lambda bi, l: (l, 0, 0)),          # b2
        pl.BlockSpec((1, 1, h), lambda bi, l: (l, 0, 0)),          # ln2_g
        pl.BlockSpec((1, 1, h), lambda bi, l: (l, 0, 0)),          # ln2_b
    ]
    return pl.pallas_call(
        functools.partial(_encoder_kernel, num_heads=nh, eps=cfg.ln_eps),
        out_shape=jax.ShapeDtypeStruct((b, s, h), jnp.bfloat16),
        grid=(b, L),
        in_specs=in_specs,
        out_specs=pl.BlockSpec((1, s, h), lambda bi, l: (bi, 0, 0)),
        scratch_shapes=[pltpu.VMEM((s, h), jnp.float32)],   # activation carry
        compiler_params=pltpu.CompilerParams(
            # batch splits across v7x's 2 TensorCores; layer axis is a carried
            # sequential loop (activation scratch + resident output block).
            dimension_semantics=("parallel", "arbitrary"),
            vmem_limit_bytes=48 * 1024 * 1024),
    )(x_emb, allowed, params["emb_ln_g"], params["emb_ln_b"],
      params["wqkv"], params["bqkv"], params["wo"], params["bo"],
      params["ln1_g"], params["ln1_b"], params["w1"], params["b1"],
      params["w2"], params["b2"], params["ln2_g"], params["ln2_b"])


# ----------------------------------------------------------------------------
# Fused classifier head: pooler + Linear + ReLU + Linear (one kernel).
# ----------------------------------------------------------------------------
def _classifier_kernel(feat_ref, w1_ref, b1_ref, w2_ref, b2_ref, o_ref,
                       *, pooling):
    feat = feat_ref[...].astype(jnp.float32)         # (B, S, H), input is bf16
    if pooling == "mean":
        # NOTE: matches the PyTorch pooler — mean over ALL positions
        # (padding positions included, as in the reference module).
        pooled = jnp.mean(feat, axis=1)
    elif pooling == "max":
        pooled = jnp.max(feat, axis=1)
    elif pooling == "last":
        pooled = feat[:, -1, :]
    else:
        pooled = feat[:, 0, :]
    h1 = jnp.maximum(
        jnp.dot(pooled.astype(jnp.bfloat16), w1_ref[...],
                preferred_element_type=jnp.float32) + b1_ref[...], 0.0)
    o_ref[...] = jnp.dot(h1.astype(jnp.bfloat16), w2_ref[...],
                         preferred_element_type=jnp.float32) + b2_ref[...]


def classifier_forward(params, cfg, feat):
    b = feat.shape[0]
    return pl.pallas_call(
        functools.partial(_classifier_kernel, pooling=cfg.pooling),
        out_shape=jax.ShapeDtypeStruct((b, cfg.labels_num), jnp.float32),
    )(feat, params["cls_w1"], params["cls_b1"],
      params["cls_w2"], params["cls_b2"])


# ----------------------------------------------------------------------------
# Decoder head: Linear + ReLU + Linear, tiled over the vocab dimension so the
# (H, vocab) weight never has to sit whole in VMEM (roberta-base vocab = 50265
# -> pad to 50304, tile 1024-2048).  The shared Linear+ReLU hidden is computed
# once at vocab-tile 0 into a VMEM scratch and reused for every tile.
# ----------------------------------------------------------------------------
def _decoder_kernel(x_ref, w1_ref, b1_ref, w2_ref, b2_ref, o_ref, h1_scr):
    @pl.when(pl.program_id(0) == 0)
    def _():
        x = x_ref[...].astype(jnp.bfloat16)
        h1_scr[...] = jnp.maximum(
            jnp.dot(x, w1_ref[...], preferred_element_type=jnp.float32)
            + b1_ref[...], 0.0)
    h1 = h1_scr[...].astype(jnp.bfloat16)
    o_ref[...] = jnp.dot(h1, w2_ref[...],
                         preferred_element_type=jnp.float32) + b2_ref[...]


def decoder_forward(params, cfg, pivot_feat):
    p_rows = pivot_feat.shape[0]
    h = cfg.hidden_size
    # bucket/pad the dynamic pivot-row count to a sublane multiple of 8
    p_pad = max(8, ((p_rows + 7) // 8) * 8)
    if p_pad != p_rows:
        pivot_feat = jnp.pad(pivot_feat, ((0, p_pad - p_rows), (0, 0)))
    # pad vocab to a 128 multiple for lane-dense stores / clean tiling
    v = cfg.vocab_size
    v_pad = ((v + 127) // 128) * 128
    w2, b2 = params["dec_w2"], params["dec_b2"]
    if v_pad != v:
        w2 = jnp.pad(w2, ((0, 0), (0, v_pad - v)))
        b2 = jnp.pad(b2, ((0, 0), (0, v_pad - v)))
    tn = min(v_pad, cfg.decoder_vocab_tile)       # 1024-2048 at real vocab
    grid = (v_pad // tn,)

    out = pl.pallas_call(
        _decoder_kernel,
        out_shape=jax.ShapeDtypeStruct((p_pad, v_pad), jnp.float32),
        grid=grid,
        in_specs=[
            pl.BlockSpec((p_pad, h), lambda j: (0, 0)),   # pivot rows (resident)
            pl.BlockSpec((h, h), lambda j: (0, 0)),       # dec_w1 (resident)
            pl.BlockSpec((1, h), lambda j: (0, 0)),       # dec_b1
            pl.BlockSpec((h, tn), lambda j: (0, j)),      # dec_w2 vocab tile
            pl.BlockSpec((1, tn), lambda j: (0, j)),      # dec_b2 vocab tile
        ],
        out_specs=pl.BlockSpec((p_pad, tn), lambda j: (0, j)),
        scratch_shapes=[pltpu.VMEM((p_pad, h), jnp.float32)],  # shared hidden
        compiler_params=pltpu.CompilerParams(
            # "arbitrary": hidden scratch is initialized at tile 0 and reused
            dimension_semantics=("arbitrary",),
            vmem_limit_bytes=48 * 1024 * 1024),
    )(pivot_feat, params["dec_w1"], params["dec_b1"], w2, b2)
    return out[:p_rows, :v]


# ----------------------------------------------------------------------------
# Model configuration / synthetic deterministic parameters
# ----------------------------------------------------------------------------
class Config:
    vocab_size = 256         # roberta-base is 50265 (pad to 50304 at real size)
    hidden_size = 32
    num_heads = 4
    num_layers = 2
    intermediate_size = 64
    max_position = 32
    labels_num = 2
    pooling = "mean"
    ln_eps = 1e-12
    decoder_vocab_tile = 128  # use 1024-2048 at real vocab size


def init_params(cfg, key):
    h, inter, L = cfg.hidden_size, cfg.intermediate_size, cfg.num_layers
    nh = cfg.num_heads
    dh = h // nh

    def nrm(k, shape):
        return 0.02 * jax.random.normal(k, shape, jnp.float32)

    keys = iter(jax.random.split(key, 16))

    # fused QKV weight; fold the 1/sqrt(dh) softmax scale into the Q columns
    # (and Q bias) at parameter-prep time -> no per-score multiply in-kernel.
    wqkv = nrm(next(keys), (L, h, 3 * h))
    wqkv = wqkv.at[:, :, :h].multiply(1.0 / math.sqrt(dh))
    bqkv = jnp.zeros((L, 1, 3 * h), jnp.float32)   # q-part already scaled (0)

    # output projection stored per-head (L, nh, dh, H) so the head-concat is
    # folded into a batched matmul + head-sum inside the kernel.
    wo = nrm(next(keys), (L, h, h)).reshape(L, nh, dh, h)

    return {
        # embeddings (gathered in glue, kept f32)
        "word_emb": nrm(next(keys), (cfg.vocab_size, h)),
        "pos_emb": nrm(next(keys), (cfg.max_position, h)),
        "type_emb": nrm(next(keys), (2, h)),
        "emb_ln_g": jnp.ones((1, h), jnp.float32),
        "emb_ln_b": jnp.zeros((1, h), jnp.float32),
        # stacked per-layer encoder weights (leading dim = layer); matmul
        # weights stored bf16 for the MXU, biases / LN params f32.
        "wqkv": wqkv.astype(jnp.bfloat16),
        "bqkv": bqkv,
        "wo": wo.astype(jnp.bfloat16),
        "bo": jnp.zeros((L, 1, h), jnp.float32),
        "ln1_g": jnp.ones((L, 1, h), jnp.float32),
        "ln1_b": jnp.zeros((L, 1, h), jnp.float32),
        "w1": nrm(next(keys), (L, h, inter)).astype(jnp.bfloat16),
        "b1": jnp.zeros((L, 1, inter), jnp.float32),
        "w2": nrm(next(keys), (L, inter, h)).astype(jnp.bfloat16),
        "b2": jnp.zeros((L, 1, h), jnp.float32),
        "ln2_g": jnp.ones((L, 1, h), jnp.float32),
        "ln2_b": jnp.zeros((L, 1, h), jnp.float32),
        # classifier: Linear(H,H) -> Dropout -> ReLU -> Linear(H, labels_num)
        "cls_w1": nrm(next(keys), (h, h)).astype(jnp.bfloat16),
        "cls_b1": jnp.zeros((1, h), jnp.float32),
        "cls_w2": nrm(next(keys), (h, cfg.labels_num)).astype(jnp.bfloat16),
        "cls_b2": jnp.zeros((1, cfg.labels_num), jnp.float32),
        # decoder: Linear(H,H) -> Dropout -> ReLU -> Linear(H, vocab_size)
        "dec_w1": nrm(next(keys), (h, h)).astype(jnp.bfloat16),
        "dec_b1": jnp.zeros((1, h), jnp.float32),
        "dec_w2": nrm(next(keys), (h, cfg.vocab_size)).astype(jnp.bfloat16),
        "dec_b2": jnp.zeros((1, cfg.vocab_size), jnp.float32),
    }


# ----------------------------------------------------------------------------
# Forward pass (matches masked_SSL_kroberta.forward semantics)
# ----------------------------------------------------------------------------
def masked_ssl_kroberta_forward(params, cfg, kg_input, ssl_label=None):
    tokens_kg, mask_kg, pos, vm = kg_input
    h = cfg.hidden_size

    # --- embedding gathers + sum (glue; fuses in XLA) ---
    # TODO(synk): segment ids hard-coded to 0, as in the reference call path.
    x = (jnp.take(params["word_emb"], tokens_kg, axis=0)
         + jnp.take(params["pos_emb"], pos, axis=0)
         + params["type_emb"][0][None, None, :]).astype(jnp.float32)

    # int8 "allowed" matrix = visible_matrix AND key-padding mask; the f32
    # additive bias is built inside the encoder kernel (4x less HBM traffic).
    allowed = (vm * mask_kg[:, None, :]).astype(jnp.int8)     # (B, S, S)

    output = encoder_forward(params, cfg, x, allowed)         # (B, S, H) bf16

    if ssl_label is None:
        return classifier_forward(params, cfg, output)        # (B, labels)
    else:
        assert tokens_kg.shape == ssl_label.shape
        flat = output.reshape(-1, h)                          # (B*S, H)
        # TODO(synk): data-dependent nonzero / index_select stays as eager
        # plain-JAX glue (dynamic output shape); breaks under jax.jit.
        pivot_index = jnp.nonzero(ssl_label.reshape(-1) > 0)[0]
        output_pivot = jnp.take(flat, pivot_index, axis=0)    # (P, H)
        return decoder_forward(params, cfg, output_pivot)     # (P, vocab)


# ----------------------------------------------------------------------------
if __name__ == "__main__":
    cfg = Config()
    key = jax.random.PRNGKey(0)
    k_par, k_tok, k_vm, k_lab = jax.random.split(key, 4)

    params = init_params(cfg, k_par)

    batch, seq = 2, 8
    tokens_kg = jax.random.randint(k_tok, (batch, seq), 0, cfg.vocab_size,
                                   dtype=jnp.int32)
    mask_kg = jnp.ones((batch, seq), dtype=jnp.int32).at[:, -1].set(0)
    pos = jnp.broadcast_to(jnp.arange(seq, dtype=jnp.int32), (batch, seq))
    # visible matrix: random 0/1 with guaranteed self-visibility
    vm = jax.random.bernoulli(k_vm, 0.7, (batch, seq, seq)).astype(jnp.int32)
    vm = jnp.maximum(vm, jnp.eye(seq, dtype=jnp.int32)[None])
    # ssl label: mark a few pivot (masked) positions, guarantee at least one
    ssl_label = jax.random.bernoulli(k_lab, 0.3, (batch, seq)).astype(jnp.int32)
    ssl_label = ssl_label.at[0, 0].set(1)

    kg_input = (tokens_kg, mask_kg, pos, vm)

    # classifier branch (ssl_label is None)
    logits = masked_ssl_kroberta_forward(params, cfg, kg_input, None)
    jax.block_until_ready(logits)
    assert logits.shape == (batch, cfg.labels_num)
    assert bool(jnp.all(jnp.isfinite(logits)))

    # masked-SSL decoder branch
    pivot_preds = masked_ssl_kroberta_forward(params, cfg, kg_input, ssl_label)
    jax.block_until_ready(pivot_preds)
    n_pivot = int(jnp.sum(ssl_label > 0))
    assert pivot_preds.shape == (n_pivot, cfg.vocab_size)
    assert bool(jnp.all(jnp.isfinite(pivot_preds)))

    print("KERNEL_OK")
</pallas_src>

<mosaic_0001>
module attributes {stable_mosaic.version = 11 : i64} {
  func.func @_encoder_kernel(%arg0: i32, %arg1: i32, %arg2: memref<1x8x32xf32, #tpu.memory_space<vmem>>, %arg3: memref<1x8x8xi8, #tpu.memory_space<vmem>>, %arg4: memref<1x32xf32, #tpu.memory_space<vmem>>, %arg5: memref<1x32xf32, #tpu.memory_space<vmem>>, %arg6: memref<1x32x96xbf16, #tpu.memory_space<vmem>>, %arg7: memref<1x1x96xf32, #tpu.memory_space<vmem>>, %arg8: memref<1x4x8x32xbf16, #tpu.memory_space<vmem>>, %arg9: memref<1x1x32xf32, #tpu.memory_space<vmem>>, %arg10: memref<1x1x32xf32, #tpu.memory_space<vmem>>, %arg11: memref<1x1x32xf32, #tpu.memory_space<vmem>>, %arg12: memref<1x32x64xbf16, #tpu.memory_space<vmem>>, %arg13: memref<1x1x64xf32, #tpu.memory_space<vmem>>, %arg14: memref<1x64x32xbf16, #tpu.memory_space<vmem>>, %arg15: memref<1x1x32xf32, #tpu.memory_space<vmem>>, %arg16: memref<1x1x32xf32, #tpu.memory_space<vmem>>, %arg17: memref<1x1x32xf32, #tpu.memory_space<vmem>>, %arg18: memref<1x8x32xbf16, #tpu.memory_space<vmem>>, %arg19: memref<8x32xf32, #tpu.memory_space<vmem>>) attributes {dimension_semantics = [#tpu.dimension_semantics<parallel>, #tpu.dimension_semantics<arbitrary>], iteration_bounds = array<i64: 2, 2>, scalar_prefetch = 0 : i64, scratch_operands = 1 : i64, tpu.core_type = #tpu.core_type<tc>, window_params = [{transform_indices = @transform_0, window_bounds = array<i64: 1, 8, 32>}, {transform_indices = @transform_1, window_bounds = array<i64: 1, 8, 8>}, {pipeline_mode = #tpu.pipeline_mode<synchronous>, transform_indices = @transform_2, window_bounds = array<i64: 1, 32>}, {pipeline_mode = #tpu.pipeline_mode<synchronous>, transform_indices = @transform_3, window_bounds = array<i64: 1, 32>}, {transform_indices = @transform_4, window_bounds = array<i64: 1, 32, 96>}, {transform_indices = @transform_5, window_bounds = array<i64: 1, 1, 96>}, {transform_indices = @transform_6, window_bounds = array<i64: 1, 4, 8, 32>}, {transform_indices = @transform_7, window_bounds = array<i64: 1, 1, 32>}, {transform_indices = @transform_8, window_bounds = array<i64: 1, 1, 32>}, {transform_indices = @transform_9, window_bounds = array<i64: 1, 1, 32>}, {transform_indices = @transform_10, window_bounds = array<i64: 1, 32, 64>}, {transform_indices = @transform_11, window_bounds = array<i64: 1, 1, 64>}, {transform_indices = @transform_12, window_bounds = array<i64: 1, 64, 32>}, {transform_indices = @transform_13, window_bounds = array<i64: 1, 1, 32>}, {transform_indices = @transform_14, window_bounds = array<i64: 1, 1, 32>}, {transform_indices = @transform_15, window_bounds = array<i64: 1, 1, 32>}, {transform_indices = @transform_16, window_bounds = array<i64: 1, 8, 32>}]} {
    %c0_i32 = arith.constant 0 : i32
    %0 = arith.cmpi eq, %arg1, %c0_i32 : i32
    %1 = arith.extui %0 : i1 to i32
    %c0_i32_0 = arith.constant 0 : i32
    %2 = arith.cmpi ne, %1, %c0_i32_0 : i32
    scf.if %2 {
      %c0_69 = arith.constant 0 : index
      %c0_70 = arith.constant 0 : index
      %c0_71 = arith.constant 0 : index
      %143 = vector.load %arg2[%c0_69, %c0_70, %c0_71] : memref<1x8x32xf32, #tpu.memory_space<vmem>>, vector<1x8x32xf32>
      %144 = vector.shape_cast %143 : vector<1x8x32xf32> to vector<8x32xf32>
      %c0_72 = arith.constant 0 : index
      %c0_73 = arith.constant 0 : index
      %145 = vector.load %arg4[%c0_72, %c0_73] : memref<1x32xf32, #tpu.memory_space<vmem>>, vector<1x32xf32>
      %c0_74 = arith.constant 0 : index
      %c0_75 = arith.constant 0 : index
      %146 = vector.load %arg5[%c0_74, %c0_75] : memref<1x32xf32, #tpu.memory_space<vmem>>, vector<1x32xf32>
      %cst_76 = arith.constant dense<0.000000e+00> : vector<8xf32>
      %147 = vector.multi_reduction <add>, %144, %cst_76 [1] : vector<8x32xf32> to vector<8xf32>
      %148 = vector.shape_cast %147 : vector<8xf32> to vector<8x1xf32>
      %cst_77 = arith.constant 3.200000e+01 : f32
      %149 = vector.broadcast %cst_77 : f32 to vector<8x1xf32>
      %150 = arith.divf %148, %149 : vector<8x1xf32>
      %151 = vector.broadcast %150 : vector<8x1xf32> to vector<8x32xf32>
      %152 = arith.subf %144, %151 : vector<8x32xf32>
      %153 = arith.mulf %152, %152 : vector<8x32xf32>
      %cst_78 = arith.constant dense<0.000000e+00> : vector<8xf32>
      %154 = vector.multi_reduction <add>, %153, %cst_78 [1] : vector<8x32xf32> to vector<8xf32>
      %155 = vector.shape_cast %154 : vector<8xf32> to vector<8x1xf32>
      %cst_79 = arith.constant 3.200000e+01 : f32
      %156 = vector.broadcast %cst_79 : f32 to vector<8x1xf32>
      %157 = arith.divf %155, %156 : vector<8x1xf32>
      %158 = vector.broadcast %150 : vector<8x1xf32> to vector<8x32xf32>
      %159 = arith.subf %144, %158 : vector<8x32xf32>
      %cst_80 = arith.constant 9.99999996E-13 : f32
      %160 = vector.broadcast %cst_80 : f32 to vector<8x1xf32>
      %161 = arith.addf %157, %160 : vector<8x1xf32>
      %162 = math.rsqrt %161 : vector<8x1xf32>
      %163 = vector.broadcast %162 : vector<8x1xf32> to vector<8x32xf32>
      %164 = arith.mulf %159, %163 : vector<8x32xf32>
      %165 = vector.broadcast %145 : vector<1x32xf32> to vector<8x32xf32>
      %166 = arith.mulf %164, %165 : vector<8x32xf32>
      %167 = vector.broadcast %146 : vector<1x32xf32> to vector<8x32xf32>
      %168 = arith.addf %166, %167 : vector<8x32xf32>
      %c0_81 = arith.constant 0 : index
      %c0_82 = arith.constant 0 : index
      %169 = vector.load %arg19[%c0_81, %c0_82] : memref<8x32xf32, #tpu.memory_space<vmem>>, vector<8x32xf32>
      tpu.vector_store %arg19[%c0_81, %c0_82], %168 {strides = array<i32>} : memref<8x32xf32, #tpu.memory_space<vmem>>, vector<8x32xf32>,
    } else {
    }
    %c0 = arith.constant 0 : index
    %c0_1 = arith.constant 0 : index
    %3 = vector.load %arg19[%c0, %c0_1] : memref<8x32xf32, #tpu.memory_space<vmem>>, vector<8x32xf32>
    %c0_2 = arith.constant 0 : index
    %c0_3 = arith.constant 0 : index
    %c0_4 = arith.constant 0 : index
    %4 = vector.load %arg3[%c0_2, %c0_3, %c0_4] : memref<1x8x8xi8, #tpu.memory_space<vmem>>, vector<1x8x8xi8>
    %5 = vector.shape_cast %4 : vector<1x8x8xi8> to vector<8x8xi8>
    %6 = arith.sitofp %5 : vector<8x8xi8> to vector<8x8xf32>
    %cst = arith.constant 1.000000e+00 : f32
    %7 = vector.broadcast %cst : f32 to vector<8x8xf32>
    %8 = arith.subf %7, %6 : vector<8x8xf32>
    %cst_5 = arith.constant -1.000000e+04 : f32
    %9 = vector.broadcast %cst_5 : f32 to vector<8x8xf32>
    %10 = arith.mulf %8, %9 : vector<8x8xf32>
    %c0_6 = arith.constant 0 : index
    %c0_7 = arith.constant 0 : index
    %c0_8 = arith.constant 0 : index
    %11 = vector.load %arg6[%c0_6, %c0_7, %c0_8] : memref<1x32x96xbf16, #tpu.memory_space<vmem>>, vector<1x32x96xbf16>
    %12 = vector.shape_cast %11 : vector<1x32x96xbf16> to vector<32x96xbf16>
    %13 = arith.truncf %3 : vector<8x32xf32> to vector<8x32xbf16>
    %cst_9 = arith.constant dense<0.000000e+00> : vector<8x96xf32>
    %14 = tpu.matmul %13, %12, %cst_9 {dimension_numbers = #tpu.dot_dimension_numbers<[1], [0], [0], [1], [0, 0, 1, 1], [], []>} : vector<8x32xbf16>, vector<32x96xbf16>, vector<8x96xf32> -> vector<8x96xf32>
    %c0_10 = arith.constant 0 : index
    %c0_11 = arith.constant 0 : index
    %c0_12 = arith.constant 0 : index
    %15 = vector.load %arg7[%c0_10, %c0_11, %c0_12] : memref<1x1x96xf32, #tpu.memory_space<vmem>>, vector<1x1x96xf32>
    %16 = vector.shape_cast %15 : vector<1x1x96xf32> to vector<1x96xf32>
    %17 = vector.broadcast %16 : vector<1x96xf32> to vector<8x96xf32>
    %18 = arith.addf %14, %17 : vector<8x96xf32>
    %19 = vector.extract_strided_slice %18 {offsets = [0, 0], sizes = [8, 32], strides = [1, 1]} : vector<8x96xf32> to vector<8x32xf32>
    %20 = vector.shape_cast %19 : vector<8x32xf32> to vector<8x4x8xf32>
    %21 = tpu.transpose %20, [1, 0, 2] : vector<8x4x8xf32> -> vector<4x8x8xf32>
    %22 = arith.truncf %21 : vector<4x8x8xf32> to vector<4x8x8xbf16>
    %23 = vector.extract_strided_slice %18 {offsets = [0, 32], sizes = [8, 32], strides = [1, 1]} : vector<8x96xf32> to vector<8x32xf32>
    %24 = vector.shape_cast %23 : vector<8x32xf32> to vector<8x4x8xf32>
    %25 = tpu.transpose %24, [1, 0, 2] : vector<8x4x8xf32> -> vector<4x8x8xf32>
    %26 = arith.truncf %25 : vector<4x8x8xf32> to vector<4x8x8xbf16>
    %27 = vector.extract_strided_slice %18 {offsets = [0, 64], sizes = [8, 32], strides = [1, 1]} : vector<8x96xf32> to vector<8x32xf32>
    %28 = vector.shape_cast %27 : vector<8x32xf32> to vector<8x4x8xf32>
    %29 = tpu.transpose %28, [1, 0, 2] : vector<8x4x8xf32> -> vector<4x8x8xf32>
    %30 = arith.truncf %29 : vector<4x8x8xf32> to vector<4x8x8xbf16>
    %cst_13 = arith.constant dense<0.000000e+00> : vector<4x8x8xf32>
    %31 = tpu.matmul %22, %26, %cst_13 {dimension_numbers = #tpu.dot_dimension_numbers<[2], [2], [1], [1], [0, 0, 0, 1, 1, 1], [0], [0]>} : vector<4x8x8xbf16>, vector<4x8x8xbf16>, vector<4x8x8xf32> -> vector<4x8x8xf32>
    %32 = vector.shape_cast %10 : vector<8x8xf32> to vector<1x8x8xf32>
    %33 = vector.broadcast %32 : vector<1x8x8xf32> to vector<4x8x8xf32>
    %34 = arith.addf %31, %33 : vector<4x8x8xf32>
    %cst_14 = arith.constant dense<0xFF800000> : vector<4x8xf32>
    %35 = vector.multi_reduction <maximumf>, %34, %cst_14 [2] : vector<4x8x8xf32> to vector<4x8xf32>
    %36 = vector.shape_cast %35 : vector<4x8xf32> to vector<4x8x1xf32>
    %37 = vector.broadcast %36 : vector<4x8x1xf32> to vector<4x8x8xf32>
    %38 = arith.subf %34, %37 : vector<4x8x8xf32>
    %39 = math.exp %38 : vector<4x8x8xf32>
    %cst_15 = arith.constant dense<0.000000e+00> : vector<4x8xf32>
    %40 = vector.multi_reduction <add>, %39, %cst_15 [2] : vector<4x8x8xf32> to vector<4x8xf32>
    %41 = vector.shape_cast %40 : vector<4x8xf32> to vector<4x8x1xf32>
    %42 = tpu.reciprocal %41 {approx = true} : vector<4x8x1xf32> -> vector<4x8x1xf32>
    %43 = vector.broadcast %42 : vector<4x8x1xf32> to vector<4x8x8xf32>
    %44 = arith.mulf %39, %43 : vector<4x8x8xf32>
    %45 = arith.truncf %44 : vector<4x8x8xf32> to vector<4x8x8xbf16>
    %cst_16 = arith.constant dense<0.000000e+00> : vector<4x8x8xf32>
    %46 = tpu.matmul %45, %30, %cst_16 {dimension_numbers = #tpu.dot_dimension_numbers<[2], [1], [1], [2], [0, 0, 0, 1, 1, 2], [0], [0]>} : vector<4x8x8xbf16>, vector<4x8x8xbf16>, vector<4x8x8xf32> -> vector<4x8x8xf32>
    %47 = arith.truncf %46 : vector<4x8x8xf32> to vector<4x8x8xbf16>
    %c0_17 = arith.constant 0 : index
    %c0_18 = arith.constant 0 : index
    %c0_19 = arith.constant 0 : index
    %c0_20 = arith.constant 0 : index
    %48 = vector.load %arg8[%c0_17, %c0_18, %c0_19, %c0_20] : memref<1x4x8x32xbf16, #tpu.memory_space<vmem>>, vector<1x4x8x32xbf16>
    %49 = vector.shape_cast %48 : vector<1x4x8x32xbf16> to vector<4x8x32xbf16>
    %cst_21 = arith.constant dense<0.000000e+00> : vector<4x8x32xf32>
    %50 = tpu.matmul %47, %49, %cst_21 {dimension_numbers = #tpu.dot_dimension_numbers<[2], [1], [1], [2], [0, 0, 0, 1, 1, 2], [0], [0]>} : vector<4x8x8xbf16>, vector<4x8x32xbf16>, vector<4x8x32xf32> -> vector<4x8x32xf32>
    %cst_22 = arith.constant dense<0.000000e+00> : vector<8x32xf32>
    %51 = vector.multi_reduction <add>, %50, %cst_22 [0] : vector<4x8x32xf32> to vector<8x32xf32>
    %c0_23 = arith.constant 0 : index
    %c0_24 = arith.constant 0 : index
    %c0_25 = arith.constant 0 : index
    %52 = vector.load %arg9[%c0_23, %c0_24, %c0_25] : memref<1x1x32xf32, #tpu.memory_space<vmem>>, vector<1x1x32xf32>
    %53 = vector.shape_cast %52 : vector<1x1x32xf32> to vector<1x32xf32>
    %54 = vector.broadcast %53 : vector<1x32xf32> to vector<8x32xf32>
    %55 = arith.addf %51, %54 : vector<8x32xf32>
    %56 = arith.addf %3, %55 : vector<8x32xf32>
    %c0_26 = arith.constant 0 : index
    %c0_27 = arith.constant 0 : index
    %c0_28 = arith.constant 0 : index
    %57 = vector.load %arg10[%c0_26, %c0_27, %c0_28] : memref<1x1x32xf32, #tpu.memory_space<vmem>>, vector<1x1x32xf32>
    %58 = vector.shape_cast %57 : vector<1x1x32xf32> to vector<1x32xf32>
    %c0_29 = arith.constant 0 : index
    %c0_30 = arith.constant 0 : index
    %c0_31 = arith.constant 0 : index
    %59 = vector.load %arg11[%c0_29, %c0_30, %c0_31] : memref<1x1x32xf32, #tpu.memory_space<vmem>>, vector<1x1x32xf32>
    %60 = vector.shape_cast %59 : vector<1x1x32xf32> to vector<1x32xf32>
    %cst_32 = arith.constant dense<0.000000e+00> : vector<8xf32>
    %61 = vector.multi_reduction <add>, %56, %cst_32 [1] : vector<8x32xf32> to vector<8xf32>
    %62 = vector.shape_cast %61 : vector<8xf32> to vector<8x1xf32>
    %cst_33 = arith.constant 3.200000e+01 : f32
    %63 = vector.broadcast %cst_33 : f32 to vector<8x1xf32>
    %64 = arith.divf %62, %63 : vector<8x1xf32>
    %65 = vector.broadcast %64 : vector<8x1xf32> to vector<8x32xf32>
    %66 = arith.subf %56, %65 : vector<8x32xf32>
    %67 = arith.mulf %66, %66 : vector<8x32xf32>
    %cst_34 = arith.constant dense<0.000000e+00> : vector<8xf32>
    %68 = vector.multi_reduction <add>, %67, %cst_34 [1] : vector<8x32xf32> to vector<8xf32>
    %69 = vector.shape_cast %68 : vector<8xf32> to vector<8x1xf32>
    %cst_35 = arith.constant 3.200000e+01 : f32
    %70 = vector.broadcast %cst_35 : f32 to vector<8x1xf32>
    %71 = arith.divf %69, %70 : vector<8x1xf32>
    %72 = vector.broadcast %64 : vector<8x1xf32> to vector<8x32xf32>
    %73 = arith.subf %56, %72 : vector<8x32xf32>
    %cst_36 = arith.constant 9.99999996E-13 : f32
    %74 = vector.broadcast %cst_36 : f32 to vector<8x1xf32>
    %75 = arith.addf %71, %74 : vector<8x1xf32>
    %76 = math.rsqrt %75 : vector<8x1xf32>
    %77 = vector.broadcast %76 : vector<8x1xf32> to vector<8x32xf32>
    %78 = arith.mulf %73, %77 : vector<8x32xf32>
    %79 = vector.broadcast %58 : vector<1x32xf32> to vector<8x32xf32>
    %80 = arith.mulf %78, %79 : vector<8x32xf32>
    %81 = vector.broadcast %60 : vector<1x32xf32> to vector<8x32xf32>
    %82 = arith.addf %80, %81 : vector<8x32xf32>
    %c0_37 = arith.constant 0 : index
    %c0_38 = arith.constant 0 : index
    %c0_39 = arith.constant 0 : index
    %83 = vector.load %arg12[%c0_37, %c0_38, %c0_39] : memref<1x32x64xbf16, #tpu.memory_space<vmem>>, vector<1x32x64xbf16>
    %84 = vector.shape_cast %83 : vector<1x32x64xbf16> to vector<32x64xbf16>
    %85 = arith.truncf %82 : vector<8x32xf32> to vector<8x32xbf16>
    %cst_40 = arith.constant dense<0.000000e+00> : vector<8x64xf32>
    %86 = tpu.matmul %85, %84, %cst_40 {dimension_numbers = #tpu.dot_dimension_numbers<[1], [0], [0], [1], [0, 0, 1, 1], [], []>} : vector<8x32xbf16>, vector<32x64xbf16>, vector<8x64xf32> -> vector<8x64xf32>
    %c0_41 = arith.constant 0 : index
    %c0_42 = arith.constant 0 : index
    %c0_43 = arith.constant 0 : index
    %87 = vector.load %arg13[%c0_41, %c0_42, %c0_43] : memref<1x1x64xf32, #tpu.memory_space<vmem>>, vector<1x1x64xf32>
    %88 = vector.shape_cast %87 : vector<1x1x64xf32> to vector<1x64xf32>
    %89 = vector.broadcast %88 : vector<1x64xf32> to vector<8x64xf32>
    %90 = arith.addf %86, %89 : vector<8x64xf32>
    %91 = arith.mulf %90, %90 : vector<8x64xf32>
    %92 = arith.mulf %90, %91 : vector<8x64xf32>
    %cst_44 = arith.constant 4.471500e-02 : f32
    %93 = vector.broadcast %cst_44 : f32 to vector<8x64xf32>
    %94 = arith.mulf %93, %92 : vector<8x64xf32>
    %95 = arith.addf %90, %94 : vector<8x64xf32>
    %cst_45 = arith.constant 0.797884583 : f32
    %96 = vector.broadcast %cst_45 : f32 to vector<8x64xf32>
    %97 = arith.mulf %96, %95 : vector<8x64xf32>
    %98 = math.tanh %97 : vector<8x64xf32>
    %cst_46 = arith.constant 1.000000e+00 : f32
    %99 = vector.broadcast %cst_46 : f32 to vector<8x64xf32>
    %100 = arith.addf %99, %98 : vector<8x64xf32>
    %cst_47 = arith.constant 5.000000e-01 : f32
    %101 = vector.broadcast %cst_47 : f32 to vector<8x64xf32>
    %102 = arith.mulf %101, %100 : vector<8x64xf32>
    %103 = arith.mulf %90, %102 : vector<8x64xf32>
    %c0_48 = arith.constant 0 : index
    %c0_49 = arith.constant 0 : index
    %c0_50 = arith.constant 0 : index
    %104 = vector.load %arg14[%c0_48, %c0_49, %c0_50] : memref<1x64x32xbf16, #tpu.memory_space<vmem>>, vector<1x64x32xbf16>
    %105 = vector.shape_cast %104 : vector<1x64x32xbf16> to vector<64x32xbf16>
    %106 = arith.truncf %103 : vector<8x64xf32> to vector<8x64xbf16>
    %cst_51 = arith.constant dense<0.000000e+00> : vector<8x32xf32>
    %107 = tpu.matmul %106, %105, %cst_51 {dimension_numbers = #tpu.dot_dimension_numbers<[1], [0], [0], [1], [0, 0, 1, 1], [], []>} : vector<8x64xbf16>, vector<64x32xbf16>, vector<8x32xf32> -> vector<8x32xf32>
    %c0_52 = arith.constant 0 : index
    %c0_53 = arith.constant 0 : index
    %c0_54 = arith.constant 0 : index
    %108 = vector.load %arg15[%c0_52, %c0_53, %c0_54] : memref<1x1x32xf32, #tpu.memory_space<vmem>>, vector<1x1x32xf32>
    %109 = vector.shape_cast %108 : vector<1x1x32xf32> to vector<1x32xf32>
    %110 = vector.broadcast %109 : vector<1x32xf32> to vector<8x32xf32>
    %111 = arith.addf %107, %110 : vector<8x32xf32>
    %112 = arith.addf %82, %111 : vector<8x32xf32>
    %c0_55 = arith.constant 0 : index
    %c0_56 = arith.constant 0 : index
    %c0_57 = arith.constant 0 : index
    %113 = vector.load %arg16[%c0_55, %c0_56, %c0_57] : memref<1x1x32xf32, #tpu.memory_space<vmem>>, vector<1x1x32xf32>
    %114 = vector.shape_cast %113 : vector<1x1x32xf32> to vector<1x32xf32>
    %c0_58 = arith.constant 0 : index
    %c0_59 = arith.constant 0 : index
    %c0_60 = arith.constant 0 : index
    %115 = vector.load %arg17[%c0_58, %c0_59, %c0_60] : memref<1x1x32xf32, #tpu.memory_space<vmem>>, vector<1x1x32xf32>
    %116 = vector.shape_cast %115 : vector<1x1x32xf32> to vector<1x32xf32>
    %cst_61 = arith.constant dense<0.000000e+00> : vector<8xf32>
    %117 = vector.multi_reduction <add>, %112, %cst_61 [1] : vector<8x32xf32> to vector<8xf32>
    %118 = vector.shape_cast %117 : vector<8xf32> to vector<8x1xf32>
    %cst_62 = arith.constant 3.200000e+01 : f32
    %119 = vector.broadcast %cst_62 : f32 to vector<8x1xf32>
    %120 = arith.divf %118, %119 : vector<8x1xf32>
    %121 = vector.broadcast %120 : vector<8x1xf32> to vector<8x32xf32>
    %122 = arith.subf %112, %121 : vector<8x32xf32>
    %123 = arith.mulf %122, %122 : vector<8x32xf32>
    %cst_63 = arith.constant dense<0.000000e+00> : vector<8xf32>
    %124 = vector.multi_reduction <add>, %123, %cst_63 [1] : vector<8x32xf32> to vector<8xf32>
    %125 = vector.shape_cast %124 : vector<8xf32> to vector<8x1xf32>
    %cst_64 = arith.constant 3.200000e+01 : f32
    %126 = vector.broadcast %cst_64 : f32 to vector<8x1xf32>
    %127 = arith.divf %125, %126 : vector<8x1xf32>
    %128 = vector.broadcast %120 : vector<8x1xf32> to vector<8x32xf32>
    %129 = arith.subf %112, %128 : vector<8x32xf32>
    %cst_65 = arith.constant 9.99999996E-13 : f32
    %130 = vector.broadcast %cst_65 : f32 to vector<8x1xf32>
    %131 = arith.addf %127, %130 : vector<8x1xf32>
    %132 = math.rsqrt %131 : vector<8x1xf32>
    %133 = vector.broadcast %132 : vector<8x1xf32> to vector<8x32xf32>
    %134 = arith.mulf %129, %133 : vector<8x32xf32>
    %135 = vector.broadcast %114 : vector<1x32xf32> to vector<8x32xf32>
    %136 = arith.mulf %134, %135 : vector<8x32xf32>
    %137 = vector.broadcast %116 : vector<1x32xf32> to vector<8x32xf32>
    %138 = arith.addf %136, %137 : vector<8x32xf32>
    %c0_66 = arith.constant 0 : index
    %c0_67 = arith.constant 0 : index
    %139 = vector.load %arg19[%c0_66, %c0_67] : memref<8x32xf32, #tpu.memory_space<vmem>>, vector<8x32xf32>
    tpu.vector_store %arg19[%c0_66, %c0_67], %138 {strides = array<i32>} : memref<8x32xf32, #tpu.memory_space<vmem>>, vector<8x32xf32>,
    %c1_i32 = arith.constant 1 : i32
    %140 = arith.cmpi eq, %arg1, %c1_i32 : i32
    %141 = arith.extui %140 : i1 to i32
    %c0_i32_68 = arith.constant 0 : i32
    %142 = arith.cmpi ne, %141, %c0_i32_68 : i32
    scf.if %142 {
      %143 = arith.truncf %138 : vector<8x32xf32> to vector<8x32xbf16>
      %c0_69 = arith.constant 0 : index
      %c0_70 = arith.constant 0 : index
      %c0_71 = arith.constant 0 : index
      %144 = vector.load %arg18[%c0_69, %c0_70, %c0_71] : memref<1x8x32xbf16, #tpu.memory_space<vmem>>, vector<1x8x32xbf16>
      %145 = vector.shape_cast %144 : vector<1x8x32xbf16> to vector<8x32xbf16>
      %146 = vector.shape_cast %143 : vector<8x32xbf16> to vector<1x8x32xbf16>
      tpu.vector_store %arg18[%c0_69, %c0_70, %c0_71], %146 {strides = array<i32>} : memref<1x8x32xbf16, #tpu.memory_space<vmem>>, vector<1x8x32xbf16>,
    } else {
    }
    return
  }
  func.func @transform_0(%arg0: i32, %arg1: i32) -> (i32, i32, i32) {
    %c0_i32 = arith.constant 0 : i32
    %c0_i32_0 = arith.constant 0 : i32
    %c0_i32_1 = arith.constant 0 : i32
    return %arg0, %c0_i32, %c0_i32_0 : i32, i32, i32
  }
  func.func @transform_1(%arg0: i32, %arg1: i32) -> (i32, i32, i32) {
    %c0_i32 = arith.constant 0 : i32
    %c0_i32_0 = arith.constant 0 : i32
    %c0_i32_1 = arith.constant 0 : i32
    return %arg0, %c0_i32, %c0_i32_0 : i32, i32, i32
  }
  func.func @transform_2(%arg0: i32, %arg1: i32) -> (i32, i32) {
    %c0_i32 = arith.constant 0 : i32
    %c0_i32_0 = arith.constant 0 : i32
    %c0_i32_1 = arith.constant 0 : i32
    return %c0_i32, %c0_i32_0 : i32, i32
  }
  func.func @transform_3(%arg0: i32, %arg1: i32) -> (i32, i32) {
    %c0_i32 = arith.constant 0 : i32
    %c0_i32_0 = arith.constant 0 : i32
    %c0_i32_1 = arith.constant 0 : i32
    return %c0_i32, %c0_i32_0 : i32, i32
  }
  func.func @transform_4(%arg0: i32, %arg1: i32) -> (i32, i32, i32) {
    %c0_i32 = arith.constant 0 : i32
    %c0_i32_0 = arith.constant 0 : i32
    %c0_i32_1 = arith.constant 0 : i32
    return %arg1, %c0_i32, %c0_i32_0 : i32, i32, i32
  }
  func.func @transform_5(%arg0: i32, %arg1: i32) -> (i32, i32, i32) {
    %c0_i32 = arith.constant 0 : i32
    %c0_i32_0 = arith.constant 0 : i32
    %c0_i32_1 = arith.constant 0 : i32
    return %arg1, %c0_i32, %c0_i32_0 : i32, i32, i32
  }
  func.func @transform_6(%arg0: i32, %arg1: i32) -> (i32, i32, i32, i32) {
    %c0_i32 = arith.constant 0 : i32
    %c0_i32_0 = arith.constant 0 : i32
    %c0_i32_1 = arith.constant 0 : i32
    %c0_i32_2 = arith.constant 0 : i32
    return %arg1, %c0_i32, %c0_i32_0, %c0_i32_1 : i32, i32, i32, i32
  }
  func.func @transform_7(%arg0: i32, %arg1: i32) -> (i32, i32, i32) {
    %c0_i32 = arith.constant 0 : i32
    %c0_i32_0 = arith.constant 0 : i32
    %c0_i32_1 = arith.constant 0 : i32
    return %arg1, %c0_i32, %c0_i32_0 : i32, i32, i32
  }
  func.func @transform_8(%arg0: i32, %arg1: i32) -> (i32, i32, i32) {
    %c0_i32 = arith.constant 0 : i32
    %c0_i32_0 = arith.constant 0 : i32
    %c0_i32_1 = arith.constant 0 : i32
    return %arg1, %c0_i32, %c0_i32_0 : i32, i32, i32
  }
  func.func @transform_9(%arg0: i32, %arg1: i32) -> (i32, i32, i32) {
    %c0_i32 = arith.constant 0 : i32
    %c0_i32_0 = arith.constant 0 : i32
    %c0_i32_1 = arith.constant 0 : i32
    return %arg1, %c0_i32, %c0_i32_0 : i32, i32, i32
  }
  func.func @transform_10(%arg0: i32, %arg1: i32) -> (i32, i32, i32) {
    %c0_i32 = arith.constant 0 : i32
    %c0_i32_0 = arith.constant 0 : i32
    %c0_i32_1 = arith.constant 0 : i32
    return %arg1, %c0_i32, %c0_i32_0 : i32, i32, i32
  }
  func.func @transform_11(%arg0: i32, %arg1: i32) -> (i32, i32, i32) {
    %c0_i32 = arith.constant 0 : i32
    %c0_i32_0 = arith.constant 0 : i32
    %c0_i32_1 = arith.constant 0 : i32
    return %arg1, %c0_i32, %c0_i32_0 : i32, i32, i32
  }
  func.func @transform_12(%arg0: i32, %arg1: i32) -> (i32, i32, i32) {
    %c0_i32 = arith.constant 0 : i32
    %c0_i32_0 = arith.constant 0 : i32
    %c0_i32_1 = arith.constant 0 : i32
    return %arg1, %c0_i32, %c0_i32_0 : i32, i32, i32
  }
  func.func @transform_13(%arg0: i32, %arg1: i32) -> (i32, i32, i32) {
    %c0_i32 = arith.constant 0 : i32
    %c0_i32_0 = arith.constant 0 : i32
    %c0_i32_1 = arith.constant 0 : i32
    return %arg1, %c0_i32, %c0_i32_0 : i32, i32, i32
  }
  func.func @transform_14(%arg0: i32, %arg1: i32) -> (i32, i32, i32) {
    %c0_i32 = arith.constant 0 : i32
    %c0_i32_0 = arith.constant 0 : i32
    %c0_i32_1 = arith.constant 0 : i32
    return %arg1, %c0_i32, %c0_i32_0 : i32, i32, i32
  }
  func.func @transform_15(%arg0: i32, %arg1: i32) -> (i32, i32, i32) {
    %c0_i32 = arith.constant 0 : i32
    %c0_i32_0 = arith.constant 0 : i32
    %c0_i32_1 = arith.constant 0 : i32
    return %arg1, %c0_i32, %c0_i32_0 : i32, i32, i32
  }
  func.func @transform_16(%arg0: i32, %arg1: i32) -> (i32, i32, i32) {
    %c0_i32 = arith.constant 0 : i32
    %c0_i32_0 = arith.constant 0 : i32
    %c0_i32_1 = arith.constant 0 : i32
    return %arg0, %c0_i32, %c0_i32_0 : i32, i32, i32
  }
}

</mosaic_0001>

<bundles_post_ra>
// kernel: tpu_custom_call.1
= control target key start
LH: loop header
LB: loop body
LE: loop exit
PB: predicated region body
PF: predicated region fallthrough
CT: control target
= control target key end

     0   :  { %s3691_s0 = inlined_call_operand.hbm [shape: f32[2,8,32], index: 0, kind: input, shape index: {}]   ;;  %s3692_s1 = inlined_call_operand.hbm [shape: s8[2,8,8], index: 1, kind: input, shape index: {}]   ;;  %s3693_s2 = inlined_call_operand.vmem [shape: f32[1,32], index: 2, kind: input, shape index: {}]   ;;  %s3694_s3 = inlined_call_operand.hbm [shape: f32[1,32], index: 3, kind: input, shape index: {}]   ;;  %s3695_s4 = inlined_call_operand.vmem [shape: bf16[2,32,96], index: 4, kind: input, shape index: {}]   ;;  %s3696_s5 = inlined_call_operand.vmem [shape: f32[2,1,96], index: 5, kind: input, shape index: {}]   ;;  %s3697_s6 = inlined_call_operand.vmem [shape: bf16[2,4,8,32], index: 6, kind: input, shape index: {}]   ;;  %s3698_s7 = inlined_call_operand.vmem [shape: f32[2,1,32], index: 7, kind: input, shape index: {}]   ;;  %s3699_s8 = inlined_call_operand.vmem [shape: f32[2,1,32], index: 8, kind: input, shape index: {}]   ;;  %s3700_s9 = inlined_call_operand.vmem [shape: f32[2,1,32], index: 9, kind: input, shape index: {}]   ;;  %s3701_s10 = inlined_call_operand.vmem [shape: bf16[2,32,64], index: 10, kind: input, shape index: {}]   ;;  %s3702_s11 = inlined_call_operand.vmem [shape: f32[2,1,64], index: 11, kind: input, shape index: {}]   ;;  %s3703_s12 = inlined_call_operand.vmem [shape: bf16[2,64,32], index: 12, kind: input, shape index: {}]   ;;  %s3704_s13 = inlined_call_operand.vmem [shape: f32[2,1,32], index: 13, kind: input, shape index: {}]   ;;  %s3705_s14 = inlined_call_operand.vmem [shape: f32[2,1,32], index: 14, kind: input, shape index: {}]   ;;  %s3706_s15 = inlined_call_operand.vmem [shape: f32[2,1,32], index: 15, kind: input, shape index: {}]   ;;  %s3707_s16 = inlined_call_operand.hbm [shape: bf16[2,8,32], index: 16, kind: output, shape index: {}]  }
   0x1   :  { %3729 = sst [smem:[#allocation27_spill]] %s3691_s0 }
   0x2   :  { %3730 = sst [smem:[#allocation28_spill]] %s3692_s1 }
   0x3   :  { %3731 = sst [smem:[#allocation29_spill]] %s3693_s2 }
   0x4   :  { %3732 = sst [smem:[#allocation30_spill]] %s3694_s3 }
   0x5   :  { %3733 = sst [smem:[#allocation31_spill]] %s3695_s4 }
   0x6   :  { %3734 = sst [smem:[#allocation32_spill]] %s3697_s6 }
   0x7   :  { %3735 = sst [smem:[#allocation33_spill]] %s3699_s8 }
   0x8   :  { %3736 = sst [smem:[#allocation34_spill]] %s3700_s9 }
   0x9   :  { %3737 = sst [smem:[#allocation35_spill]] %s3701_s10 }
   0xa   :  { %3738 = sst [smem:[#allocation36_spill]] %s3702_s11 }
   0xb   :  { %3739 = sst [smem:[#allocation37_spill]] %s3703_s12 }
   0xc   :  { %3740 = sst [smem:[#allocation38_spill]] %s3704_s13 }
   0xd   :  { %3741 = sst [smem:[#allocation39_spill]] %s3705_s14 }
   0xe   :  { %3742 = sst [smem:[#allocation40_spill]] %s3706_s15 }
   0xf   :  { %3743 = sst [smem:[#allocation41_spill]] %s3707_s16 }
  0x10   :  { %21 = vsyncpa [#allocation4], 0 }
  0x11   :  { %23 = vsyncpa [#allocation4 + $0x1], 0 }
  0x12   :  { %24 = vsyncpa [#allocation7], 0 }
  0x13   :  { %26 = vsyncpa [#allocation7 + $0x1], 0 }
  0x14   :  { %27 = vsyncpa [#allocation5], 0 }
  0x15   :  { %29 = vsyncpa [#allocation5 + $0x1], 0  ;;  %s3092_s21 = smov 0   ;;  %s3094_s22 = smov 0  }
  0x16   :  { %s3096_s23 = smov 0   ;;  %s3098_s24 = smov 0  }
  0x17   :  { %s3100_s25 = smov 0   ;;  %s3102_s26 = smov 0  }
  0x18   :  { %s3104_s27 = smov 0   ;;  %s3106_s28 = smov 0  }
  0x19 LB: > { %3744 = sst [smem:[#allocation14_spill]] %s2964_s21  ;;  %s3133_s29 = sadd.s32 4294967295, %s2992_s28   ;;  %s2992_s28 = sphi %s3106_s28, %s35_s28   ;;  %s2988_s27 = sphi %s3104_s27, %s3813_s27   ;;  %s2984_s26 = sphi %s3102_s26, %s3812_s26   ;;  %s2980_s25 = sphi %s3100_s25, %s3811_s25   ;;  %s2976_s24 = sphi %s3098_s24, %s3810_s24   ;;  %s2972_s23 = sphi %s3096_s23, %s3809_s23   ;;  %s2968_s22 = sphi %s3094_s22, %s3808_s22   ;;  %s2964_s21 = sphi %s3092_s21, %s3807_s21  }
  0x1a   : > { %3745 = sst [smem:[#allocation15_spill]] %s2968_s22  ;;  %s2458_s30 = sadd.s32 4294967294, %s2992_s28  }
  0x1b   : > { %3746 = sst [smem:[#allocation16_spill]] %s2972_s23  ;;  %p3716_p0 = scmp.ne.s32.totalorder %s2972_s23, %s2968_s22 }
  0x1c   : > { %3747 = sst [smem:[#allocation17_spill]] %s2980_s25  ;;  %p67_p1 = scmp.ne.s32.totalorder %s2968_s22, %s2964_s21 }
  0x1d   : > { %3748 = sst [smem:[#allocation18_spill]] %s2984_s26  ;;  %p3715_p2 = scmp.eq.s32.totalorder %s3133_s29, 0 }
  0x1e   : > { %3749 = sst [smem:[#allocation19_spill]] %s2988_s27  ;;  %p471_p3 = scmp.eq.s32.totalorder %s3133_s29, 3 }
  0x1f   : > { %3750 = sst [smem:[#allocation20_spill]] %s2992_s28  ;;  %p477_p4 = scmp.eq.s32.totalorder %s2458_s30, 3 }
  0x20   : > { %p3145_p5 = por %p3715_p2, %p67_p1  ;;  %p2459_p6 = scmp.ge.s32.totalorder %s2992_s28, 1 }
  0x21   : > { %p3153_p7 = por %p471_p3, %p3716_p0  ;;  %p3157_p8 = por %p477_p4, %p67_p1 }
  0x22   : > { %s3751_s17 = scalar_select %p3145_p5, 1, 0 }
  0x23   : > { %s3752_s18 = scalar_select %p3153_p7, 1, 0 }
  0x24   : > { %s3754_s19 = scalar_select %p3157_p8, 1, 0 }
  0x25   : > { %3753 = sst [smem:[#allocation21_spill]] %s3752_s18  ;;  %p484_p9 = scmp.lt.s32.totalorder %s2992_s28, 5 }
  0x26   : > { %3755 = sst [smem:[#allocation22_spill]] %s3754_s19  ;;  %s2994_s30 = smov [#allocation8]  }
  0x27   : > { %p3162_p10 = pnand %p2459_p6, %p484_p9  ;;  %s500_s0 = sshll.u32 %s2994_s30, 4  ;;  %s501_s0 = int_to_ptr.vmem [resolvable:$true] %s500_s0 }
  0x28   : > { %s44_s16 = sadd.s32 1, %s2984_s26  ;;  %s47_s18 = sadd.s32 1, %s2988_s27 }
  0x29   : > { %s3756_s20 = scalar_select %p3162_p10, 1, 0 }
  0x2a   : > { %p2673_p11 = pneg %p3162_p10  ;;  %p3175_p13 = scmp.ge.s32.totalorder %s44_s16, 2 }
  0x2b   : > { %s3759_s3 = sld [smem:[#allocation30_spill]] }
  0x2c   : > { %p3170_p12 = pnand %p2673_p11, %p3715_p2 }
  0x2d   : > { %s3758_s19 = scalar_select %p3175_p13, 1, 0 }
  0x2e   : > { %p2800_p4 = pneg %p3170_p12 }
  0x31   : > { %s2798_s30 = scalar_lea.hbm %s3759_s3, 16 }
  0x32   : > { %p2799_p3 = scmp.ne.s32.totalorder %s3759_s3, %s2798_s30  ;;  %p2805_p11 = scmp.lt.u32.totalorder %s2798_s30, %s3759_s3 }
  0x34   : > { %p2801_p6 = pnand %p2800_p4, %p2799_p3 }
  0x36   : > { %p2802_p9 = pneg %p2801_p6 }
  0x38   : > { %p2807_p2 = pnand %p2805_p11, %p2802_p9 }
  0x3a   : > { %2810 = shalt.err (!%p2807_p2)
}
  0x3b   : > { %s2811_s12 = scalar_lea.vmem %s501_s0, 16  ;;  %s2818_s2 = scalar_lea.vmem %s501_s0, 32 }
  0x3c   : > { %p2812_p1 = scmp.ne.s32.totalorder %s501_s0, %s2811_s12  ;;  %p2819_p7 = scmp.lt.s32.totalorder %s501_s0, %s501_s0 }
  0x3d   : > { %p2820_p5 = scmp.lt.s32.totalorder %s2818_s2, %s2811_s12 }
  0x3e   : > { %p2814_p0 = pnand %p2812_p1, %p2800_p4 }
  0x3f   : > { %p2821_p10 = por %p2820_p5, %p2819_p7 }
  0x40   : > { %p2815_p8 = pneg %p2814_p0 }
  0x42   : > { %p2822_p13 = pnand %p2821_p10, %p2815_p8 }
  0x44   : > { %2825 = shalt.err (!%p2822_p13)
}
  0x45   : > { %2676 = dma.hbm_to_vmem [thread:$0]  (!%p3170_p12), %s3759_s3, 16, %s501_s0, [#allocation7]  }
  0x46   : > { %p3760_p0 = scmp.ne.s32.totalorder %s3758_s19, 0  ;;  %p3762_p2 = scmp.ne.s32.totalorder %s2972_s23, %s2968_s22 }
  0x47   : > { %p3763_p5 = scmp.eq.s32.totalorder %s2992_s28, 0  ;;  %p2689_p8 = scmp.lt.s32.totalorder %s2992_s28, 4 }
  0x48   : > { %s3815_s16 = smov (%p3760_p0, %s44_s16), 0  ;;  %s3817_s18 = smov (!%p3760_p0, %s47_s18), %s2988_s27 }
  0x49   : > { %3761 = sst [smem:[#allocation23_spill]] %s3815_s16  ;;  %p3209_p7 = por %p3763_p5, %p3762_p2 }
  0x4a   : > { %p49_p10 = scmp.ge.s32.totalorder %s3817_s18, 2  ;;  %s3215_s13 = sand.u32 1, %s2972_s23  }
  0x4b   : > { %s2462_s21 = sshll.u32 %s3215_s13, 3  ;;  %s2463_s25 = sshll.u32 %s2988_s27, 7 }
  0x4c   : > { %s3819_s18 = smov (%p49_p10, %s3817_s18), 0  ;;  %s3766_s30 = sld [smem:[#allocation27_spill]] }
  0x4d   : > { %3765 = sst [smem:[#allocation24_spill]] %s3819_s18  ;;  %s51_s26 = ssub.s32 %s2988_s27, %s3819_s18 }
  0x4e   : > { %p52_p12 = scmp.eq.s32.totalorder %s51_s26, 0  ;;  %s515_s14 = scalar_lea.vmem [#allocation3], %s2462_s21 }
  0x4f   : > { %s522_s15 = sshll.u32 %s515_s14, 4  ;;  %p3232_p13 = pnand %p2689_p8, %p3209_p7  ;;  %s3228_s15 = int_to_ptr.vmem [resolvable:$true] %s522_s15 }
  0x50   : > { %s3768_s18 = sadd.s32 1, %s2972_s23  ;;  %s512_s19 = scalar_lea.sflag [#allocation4], %s3215_s13 }
  0x51   : > { %s3239_s0 = scalar_select %p52_p12, %s2972_s23, %s3768_s18  }
  0x52   : > { %s3226_s2 = scalar_lea.hbm %s3766_s30, %s2463_s25  ;;  %p2828_p3 = pneg %p3232_p13 }
  0x53   : > { %3769 = sst [smem:[#allocation25_spill]] %s3239_s0  ;;  %s2826_s16 = scalar_lea.hbm %s3226_s2, 128 }
  0x54   : > { %p2827_p1 = scmp.ne.s32.totalorder %s3226_s2, %s2826_s16  ;;  %s2831_s26 = scalar_lea.hbm %s3766_s30, 256 }
  0x55   : > { %p2832_p9 = scmp.lt.u32.totalorder %s3226_s2, %s3766_s30  ;;  %p2833_p11 = scmp.lt.u32.totalorder %s2831_s26, %s2826_s16 }
  0x56   : > { %p2829_p4 = pnand %p2828_p3, %p2827_p1  ;;  %p2835_p2 = scmp.lt.u32.totalorder %s2826_s16, %s3226_s2 }
  0x57   : > { %p2834_p0 = por %p2833_p11, %p2832_p9 }
  0x58   : > { %p2830_p6 = pneg %p2829_p4 }
  0x59   : > { %p2836_p5 = por %p2835_p2, %p2834_p0 }
  0x5b   : > { %p2837_p7 = pnand %p2836_p5, %p2830_p6 }
  0x5d   : > { %2840 = shalt.err (!%p2837_p7)
}
  0x5e   : > { %s2841_s18 = scalar_lea.vmem %s3228_s15, 128  ;;  %s2995_s12 = smov [#allocation3]  }
  0x5f   : > { %p2842_p8 = scmp.ne.s32.totalorder %s3228_s15, %s2841_s18  ;;  %s2846_s21 = sshll.u32 %s2995_s12, 4  ;;  %s2847_s21 = int_to_ptr.vmem [resolvable:$false] %s2846_s21 }
  0x60   : > { %s2848_s11 = scalar_lea.vmem %s2847_s21, 256  ;;  %p2849_p1 = scmp.lt.s32.totalorder %s3228_s15, %s2847_s21 }
  0x61   : > { %p2844_p10 = pnand %p2842_p8, %p2828_p3  ;;  %p2850_p4 = scmp.lt.s32.totalorder %s2848_s11, %s2841_s18 }
  0x63   : > { %p2845_p12 = pneg %p2844_p10  ;;  %p2851_p9 = por %p2850_p4, %p2849_p1 }
  0x65   : > { %p2852_p11 = pnand %p2851_p9, %p2845_p12 }
  0x67   : > { %2855 = shalt.err (!%p2852_p11)
}
  0x68   : > { %2680 = dma.hbm_to_vmem [thread:$0]  (!%p3232_p13), %s3226_s2, 128, %s3228_s15, %s512_s19  }
  0x69   : > { %s2464_s16 = sshll.u32 %s3215_s13, 1  ;;  %s2465_s26 = sshll.u32 %s2988_s27, 5 }
  0x6a   : > { %s3770_s1 = sld [smem:[#allocation28_spill]]  ;;  %s533_s18 = scalar_lea.vmem [#allocation6], %s2464_s16 }
  0x6b   : > { %s540_s21 = sshll.u32 %s533_s18, 4  ;;  %s3771_s11 = sand.u32 1, %s2992_s28   ;;  %s541_s21 = int_to_ptr.vmem [resolvable:$true] %s540_s21 }
  0x6c   : > { %s530_s30 = scalar_lea.sflag [#allocation7], %s3771_s11 }
  0x70   : > { %s3273_s25 = scalar_lea.hbm %s3770_s1, %s2465_s26  ;;  %s2861_s15 = scalar_lea.hbm %s3770_s1, 64 }
  0x71   : > { %s2856_s0 = scalar_lea.hbm %s3273_s25, 32  ;;  %p2862_p5 = scmp.lt.u32.totalorder %s3273_s25, %s3770_s1 }
  0x72   : > { %p2857_p6 = scmp.ne.s32.totalorder %s3273_s25, %s2856_s0  ;;  %p2863_p7 = scmp.lt.u32.totalorder %s2861_s15, %s2856_s0 }
  0x73   : > { %p2865_p10 = scmp.lt.u32.totalorder %s2856_s0, %s3273_s25 }
  0x74   : > { %p2859_p0 = pnand %p2857_p6, %p2828_p3  ;;  %p2864_p8 = por %p2863_p7, %p2862_p5 }
  0x76   : > { %p2860_p2 = pneg %p2859_p0  ;;  %p2866_p12 = por %p2865_p10, %p2864_p8 }
  0x78   : > { %p2867_p1 = pnand %p2866_p12, %p2860_p2 }
  0x7a   : > { %2870 = shalt.err (!%p2867_p1)
}
  0x7b   : > { %s2871_s16 = scalar_lea.vmem %s541_s21, 32  ;;  %s2996_s14 = smov [#allocation6]  }
  0x7c   : > { %p2872_p4 = scmp.ne.s32.totalorder %s541_s21, %s2871_s16  ;;  %s2876_s12 = sshll.u32 %s2996_s14, 4  ;;  %s2877_s12 = int_to_ptr.vmem [resolvable:$false] %s2876_s12 }
  0x7d   : > { %s2878_s18 = scalar_lea.vmem %s2877_s12, 64  ;;  %p2879_p6 = scmp.lt.s32.totalorder %s541_s21, %s2877_s12 }
  0x7e   : > { %p2874_p9 = pnand %p2872_p4, %p2828_p3  ;;  %p2880_p0 = scmp.lt.s32.totalorder %s2878_s18, %s2871_s16 }
  0x80   : > { %p2875_p11 = pneg %p2874_p9  ;;  %p2881_p5 = por %p2880_p0, %p2879_p6 }
  0x82   : > { %p2882_p7 = pnand %p2881_p5, %p2875_p11 }
  0x84   : > { %2885 = shalt.err (!%p2882_p7)
}
  0x85   : > { %2683 = dma.hbm_to_vmem [thread:$0]  (!%p3232_p13), %s3273_s25, 32, %s541_s21, %s530_s30  }
  0x86   : > { %p3772_p2 = scmp.ne.s32.totalorder %s3756_s20, 0 }
  0x88   : > { %629 = sbr.rel (%p3772_p2) target bundleno = 3096 (0xc18), region = 84 }
  0x8f   : > { %s3299_s0 = sand.u32 1, %s2968_s22   ;;  %p3774_p3 = scmp.ne.s32.totalorder %s3751_s17, 0 }
  0x90   : > { %3773 = sst [smem:[#allocation26_spill]] %s3299_s0  ;;  %s2467_s11 = sshll.u32 %s3299_s0, 3 }
  0x91   : > { %s632_s13 = scalar_lea.sflag [#allocation4], %s3299_s0  ;;  %s3303_s2 = scalar_lea.vmem [#allocation3], %s2467_s11 }
  0x92   : > { %2947 = dma.done.wait (%p3774_p3), %s632_s13, 128  }
  0x93   : > { %2949 = vsyncadd (%p3774_p3), %s632_s13, 4294967168  ;;  %s640_s3 = sand.u32 1, %s3133_s29   ;;  %s2468_s20 = sshll.u32 %s3299_s0, 1 }
  0x94   : > { %s641_s30 = scalar_lea.sflag [#allocation7], %s640_s3  ;;  %s3311_s25 = scalar_lea.vmem [#allocation6], %s2468_s20 }
  0x95   : > { %2951 = dma.done.wait (%p3774_p3), %s641_s30, 32  }
  0x96   : > { %2953 = vsyncadd (%p3774_p3), %s641_s30, 4294967264  ;;  %p3775_p13 = scmp.eq.s32.totalorder %s3133_s29, 0 }
  0x98   : > { %2955 = dma.done.wait (%p3775_p13), [#allocation7], 16   ;;  %p3776_p8 = pmov %p3775_p13 }
  0x99   : > { %s2470_s21 = sshll.u32 %s3299_s0, 2  ;;  %p746_p10 = scmp.lt.s32.totalorder %s2976_s24, 1 }
  0x9a   : > { %2957 = vsyncadd (%p3776_p8), [#allocation7], 4294967280  ;;  %s3777_s4 = sld [smem:[#allocation31_spill]]  ;;  %s3778_s6 = sld [smem:[#allocation32_spill]] }
  0x9b   : > { %s3324_s15 = scalar_select %p746_p10, %s2976_s24, 1 }
  0x9c   : > { %s3781_s10 = sld [smem:[#allocation35_spill]]  ;;  %s3783_s30 = sld [smem:[#allocation37_spill]] }
  0x9d   : > { %s2524_s17 = sshll.u32 %s3324_s15, 4  ;;  %s2527_s28 = sshll.u32 %s3324_s15, 5 }
  0x9e   : > { %s3784_s23 = sld [smem:[#allocation38_spill]]  ;;  %s3785_s9 = sld [smem:[#allocation39_spill]] }
  0x9f   : > { %s3380_s18 = scalar_lea.vmem [#allocation9], %s2470_s21  ;;  %p2479_p12 = scmp.ne.s32.totalorder %s2976_s24, 0 }
  0xa0   : > { %s3334_s12 = scalar_lea.vmem %s3777_s4, %s2524_s17  ;;  %s3339_s13 = scalar_lea.vmem %s3778_s6, %s2524_s17  ;;  %v795_v0 = vld [vmem:[%s3303_s2] sm:$0xff] (!%p2479_p12)  ;;  %vm798_vm0 = vcmask (!%p2479_p12), 261120   ;;  %v2481_v13 = vld [vmem:[#allocation8] ss:$0 sm:$0xff] (!%p2479_p12) }
  0xa1   : > { %s3782_s6 = sld [smem:[#allocation36_spill]]  ;;  %v799_v1 = vsel (!%p2479_p12), %vm798_vm0, %v795_v0, 0.0 }
  0xa2   : > { %s3356_s4 = scalar_lea.vmem %s3781_s10, %s2524_s17  ;;  %s3366_s0 = scalar_lea.vmem %s3783_s30, %s2527_s28  ;;  %800 = vadd.xlane.f32.xlu0 (!%p2479_p12), %v799_v1 }
  0xa3   : > { %s3786_s10 = sld [smem:[#allocation40_spill]]  ;;  %794 = sbr.rel (%p2479_p12) target bundleno = 475 (0x1db), region = 100 }
  0xa4   : > { %s783_s29 = scalar_lea.vmem %s3784_s23, %s3324_s15  ;;  %s786_s16 = scalar_lea.vmem %s3785_s9, %s3324_s15 }
  0xa7   : > { %s775_s22 = scalar_lea.vmem %s3782_s6, %s3324_s15 }
  0xa9   : > { %s789_s8 = scalar_lea.vmem %s3786_s10, %s3324_s15  ;;  %s3787_s10 = sld [smem:[#allocation29_spill]] (!%p2479_p12) }
  0xaf   : > { %v2480_v11 = vld [vmem:[%s3787_s10] ss:$0 sm:$0xff] }
 0x12f   : > { %v801_v2 = vpop.xlane.xlu0 %800 }
 0x130   : > { %v803_v3 = vmul.f32 0.03125, %v801_v2 }
 0x132   : > { %v804_v4 = vsub.f32 %v795_v0, %v803_v3 }
 0x134   : > { %v805_v5 = vmul.f32 %v804_v4, %v804_v4 }
 0x136   : > { %v806_v6 = vsel %vm798_vm0, %v805_v5, 0.0 }
 0x137   : > { %807 = vadd.xlane.f32.xlu0 %v806_v6 }
 0x1c4   : > { %v808_v7 = vpop.xlane.xlu0 %807 }
 0x1c5   : > { %v809_v8 = vmul.f32 0.03125, %v808_v7 }
 0x1c7   : > { %v810_v9 = vadd.f32 1e-12, %v809_v8 }
 0x1c9   : > { %2766 = vrsqrt.f32 %v810_v9 }
 0x1d3   : > { %v2767_v10 = vpop.eup %2766 }
 0x1d4   : > { %v812_v12 = vmul.f32 %v2767_v10, %v804_v4 }
 0x1d6   : > { %v819_v14 = vmul.f32 %v2480_v11, %v812_v12 }
 0x1d8   : > { %v826_v15 = vadd.f32 %v2481_v13, %v819_v14 }
 0x1da   : > { %827 = vst.msk [vmem:[#allocation2] sm:$0xff] %vm798_vm0, %v826_v15 }
 0x1db PF: > { %v2768_v16 = vld [vmem:[%s3334_s12] sm:$0xff]   ;;  %v2997_v17 = vmov 0.0   ;;  %v2769_v18 = vld [vmem:[%s3334_s12 + $0x8] sm:$0xff]   ;;  %vm2998_vm1 = vmmov 0   ;;  %vm858_vm2 = vcmask 261120   ;;  %s3788_s2 = scalar_lea.vmem %s3696_s5, %s3324_s15  ;;  %s2999_s21 = smov 104   ;;  %v917_v32 = vlaneseq }
 0x1dc   : > { %2563 = vmatprep.subr.bf16.mxu1 %v2997_v17  ;;  %2577 = vmatprep.subr.bf16.mxu0 %v2997_v17  ;;  %v2482_v21 = vld [vmem:[%s3788_s2] ss:$0 sm:$0xff]  ;;  %s3000_s26 = smov 120   ;;  %s3001_s12 = smov 96   ;;  %v3003_v30 = vmov 1983009808  }
 0x1dd   : > { %2564 = vmatpush3.bf16.msra.mxu1 %v2768_v16  ;;  %2567 = vmatprep.mubr.msk.bf16.mxu1 %vm2998_vm1, %v2997_v17  ;;  %s3002_s30 = smov 112   ;;  %v915_v31 = vunpack.c.l.s4 %v3003_v30  ;;  %v918_v34 = vshrl.u32 %v917_v32, 7  ;;  %v3004_v35 = vmov 1934713408   ;;  %vm1356_vm3 = vcmask 64512   ;;  %s3789_s3 = scalar_lea.vmem %s3698_s7, %s3324_s15 }
 0x1de   : > { %2565 = vmatprep.subr.bf16.mxu1 %v2997_v17  ;;  %2579 = vmatprep.mubr.msk.bf16.mxu0 %vm2998_vm1, %v2997_v17  ;;  %v947_v36 = vunpack.c.l.s4 %v3004_v35  ;;  %vm1592_vm4 = vcmask 1043456   ;;  %s3790_s27 = sld [smem:[#allocation33_spill]]  ;;  %vm2128_vm5 = vcmask 523264   ;;  %p2519_p1 = scmp.ne.s32.totalorder %s2976_s24, 1 }
 0x1df   : > { %v916_v33 = vunpack.c.0.s8 %v915_v31  ;;  %vm2208_vm6 = vcmask (!%p2519_p1), 257024  }
 0x1e0   : > { %v948_v42 = vunpack.c.0.s8 %v947_v36 }
 0x1e1   : > { %v3396_v19 = vld [vmem:[#allocation2] sm:$0xff]  ;;  %2566 = vmatpush3.bf16.msra.mxu1 %v2769_v18  ;;  %v3431_v39 = vsub.s32 %v916_v33, %v918_v34 }
 0x1e2   : > { %v838_v20 = vpack.c.bf16 %v3396_v19, %v3396_v19  ;;  %2571 = vmatprep.subr.bf16.mxu1 %v2997_v17  ;;  %v3441_v49 = vsub.s32 %v948_v42, %v918_v34 }
 0x1e4   : > { %2568 = vmatmul.mubr.msk.bf16.vlgmr.msra.gmra.mrb[0].mxu1 %vm858_vm2, %v838_v20  ;;  %s3791_s19 = scalar_lea.vmem %s3790_s27, %s3324_s15 }
 0x1e5   : > { %2573 = vmatprep.mubr.msk.bf16.mxu1 %vm2998_vm1, %v2997_v17 }
 0x2b7   : > { %v896_v22 = vpop.f32.mrb[0].mxu1 }
 0x2b8   : > { %v3412_v23 = vadd.f32 %v2482_v21, %v896_v22  ;;  %v2569_v24 = vpop.f32.mrb[1].mxu1 }
 0x2b9   : > { %v899_v25 = vpop.f32.mrb[2].mxu1 }
 0x2ba   : > { %909 = vrot.lane.b32.xlu1 %v3412_v23, %s2999_s21  ;;  %903 = vrot.lane.b32.xlu0 %v3412_v23, %s3000_s26  ;;  %v2570_v26 = vpop.f32.mrb[3].mxu1 }
 0x2be   : > { %1052 = vrot.lane.b32.xlu1 %v3412_v23, %s3001_s12  ;;  %906 = vrot.lane.b32.xlu0 %v3412_v23, %s3002_s30 }
 0x32c   : > { %v3418_v27 = vpop.permute.xlu0 %903  ;;  %v3421_v28 = vpop.permute.xlu1 %909 }
 0x32d   : > { %1054 = vrot.lane.b32.xlu0 %v3418_v27, %s3001_s12  ;;  %v928_v40 = vcombine.low %v3418_v27, %v3421_v28  ;;  %v929_v41 = vcombine.high %v3418_v27, %v3421_v28 }
 0x32f   : > { %v936_v45 = vrot.slane %v928_v40, %v3431_v39  ;;  %v943_v46 = vrot.slane %v929_v41, %v3431_v39 }
 0x330   : > { %v3423_v29 = vpop.permute.xlu0 %906  ;;  %v1053_v47 = vpop.permute.xlu1 %1052 }
 0x331   : > { %1058 = vrot.lane.b32.xlu0 %v3421_v28, %s3001_s12  ;;  %1056 = vrot.lane.b32.xlu1 %v3423_v29, %s3001_s12  ;;  %v912_v37 = vcombine.low %v3412_v23, %v3423_v29  ;;  %v913_v38 = vcombine.high %v3412_v23, %v3423_v29 }
 0x333   : > { %v920_v43 = vrot.slane %v912_v37, %v3431_v39  ;;  %v927_v44 = vrot.slane %v913_v38, %v3431_v39 }
 0x335   : > { %v944_v50 = vcombine.low %v920_v43, %v936_v45  ;;  %v945_v51 = vcombine.high %v920_v43, %v936_v45  ;;  %v960_v52 = vcombine.low %v927_v44, %v943_v46  ;;  %v961_v53 = vcombine.high %v927_v44, %v943_v46 }
 0x337   : > { %v952_v60 = vrot.slane %v944_v50, %v3441_v49  ;;  %v959_v61 = vrot.slane %v945_v51, %v3441_v49  ;;  %v968_v62 = vrot.slane %v960_v52, %v3441_v49  ;;  %v975_v63 = vrot.slane %v961_v53, %v3441_v49 }
 0x339   : > { %v980_v8 = vcombine.low %v952_v60, %v959_v61  ;;  %v2486_v9 = vcombine.high %v952_v60, %v959_v61  ;;  %v996_v10 = vcombine.low %v968_v62, %v975_v63  ;;  %v2487_v11 = vcombine.high %v968_v62, %v975_v63 }
 0x33b   : > { %v987_v22 = vrot.slane %v980_v8, %v3431_v39  ;;  %v995_v24 = vrot.slane %v2486_v9, %v3431_v39  ;;  %v1003_v25 = vrot.slane %v996_v10, %v3431_v39  ;;  %v1011_v26 = vrot.slane %v2487_v11, %v3431_v39  ;;  %v829_v8 = vld [vmem:[%s3311_s25] sm:$0x3]  ;;  %s3005_s25 = smov 64  }
 0x33c   : > { %v830_v9 = vunpack.c.0.s8 %v829_v8 }
 0x33d   : > { %v1012_v41 = vcombine.low %v987_v22, %v995_v24  ;;  %v1028_v42 = vcombine.low %v1003_v25, %v1011_v26 }
 0x33e   : > { %v831_v10 = vcvt.s32.f32 %v830_v9 }
 0x33f   : > { %v1020_v50 = vrot.slane %v1012_v41, %v3441_v49  ;;  %v1036_v51 = vrot.slane %v1028_v42, %v3441_v49 }
 0x340   : > { %v832_v11 = vsub.f32 1.0, %v831_v10 }
 0x39f   : > { %v1055_v48 = vpop.permute.xlu0 %1054 }
 0x3a3   : > { %v1057_v54 = vpop.permute.xlu1 %1056  ;;  %v1059_v55 = vpop.permute.xlu0 %1058 }
 0x3a4   : > { %v1064_v56 = vcombine.low %v1053_v47, %v1057_v54  ;;  %v1065_v57 = vcombine.high %v1053_v47, %v1057_v54  ;;  %v1080_v58 = vcombine.low %v1055_v48, %v1059_v55  ;;  %v1081_v59 = vcombine.high %v1055_v48, %v1059_v55 }
 0x3a6   : > { %v1072_v0 = vrot.slane %v1064_v56, %v3431_v39  ;;  %v1079_v1 = vrot.slane %v1065_v57, %v3431_v39  ;;  %v1088_v2 = vrot.slane %v1080_v58, %v3431_v39  ;;  %v1095_v3 = vrot.slane %v1081_v59, %v3431_v39 }
 0x3a7   : > { %v1013_v56 = vcombine.high %v987_v22, %v995_v24  ;;  %v1044_v57 = vcombine.low %v1020_v50, %v1036_v51  ;;  %v1045_v58 = vcombine.high %v1020_v50, %v1036_v51  ;;  %v1029_v59 = vcombine.high %v1003_v25, %v1011_v26 }
 0x3a8   : > { %v1096_v4 = vcombine.low %v1072_v0, %v1088_v2  ;;  %v1097_v5 = vcombine.high %v1072_v0, %v1088_v2  ;;  %v1112_v6 = vcombine.low %v1079_v1, %v1095_v3  ;;  %v1113_v7 = vcombine.high %v1079_v1, %v1095_v3 }
 0x3a9   : > { %v1048_v62 = vpack.c.bf16 %v1044_v57, %v1044_v57  ;;  %v1049_v63 = vpack.c.bf16 %v1045_v58, %v1045_v58  ;;  %v1027_v0 = vrot.slane %v1013_v56, %v3441_v49  ;;  %v1043_v1 = vrot.slane %v1029_v59, %v3441_v49 }
 0x3aa   : > { %v1104_v12 = vrot.slane %v1096_v4, %v3441_v49  ;;  %v1111_v13 = vrot.slane %v1097_v5, %v3441_v49  ;;  %v1120_v14 = vrot.slane %v1112_v6, %v3441_v49  ;;  %v1127_v15 = vrot.slane %v1113_v7, %v3441_v49 }
 0x3ab   : > { %v1046_v4 = vcombine.low %v1027_v0, %v1043_v1  ;;  %v1047_v5 = vcombine.high %v1027_v0, %v1043_v1 }
 0x3ac   : > { %v1132_v16 = vcombine.low %v1104_v12, %v1111_v13  ;;  %v2488_v18 = vcombine.high %v1104_v12, %v1111_v13  ;;  %v1148_v20 = vcombine.low %v1120_v14, %v1127_v15  ;;  %v2489_v21 = vcombine.high %v1120_v14, %v1127_v15 }
 0x3ad   : > { %v1050_v6 = vpack.c.bf16 %v1046_v4, %v1046_v4  ;;  %v1051_v7 = vpack.c.bf16 %v1047_v5, %v1047_v5  ;;  %v833_v12 = vmul.f32 -10000.0, %v832_v11 }
 0x3ae   : > { %v1139_v30 = vrot.slane %v1132_v16, %v3431_v39  ;;  %v1147_v31 = vrot.slane %v2488_v18, %v3431_v39  ;;  %v1155_v32 = vrot.slane %v1148_v20, %v3431_v39  ;;  %v1163_v33 = vrot.slane %v2489_v21, %v3431_v39 }
 0x3b0   : > { %v1164_v34 = vcombine.low %v1139_v30, %v1147_v31  ;;  %v1180_v35 = vcombine.low %v1155_v32, %v1163_v33  ;;  %v1165_v36 = vcombine.high %v1139_v30, %v1147_v31  ;;  %v1181_v37 = vcombine.high %v1155_v32, %v1163_v33 }
 0x3b2   : > { %v1172_v38 = vrot.slane %v1164_v34, %v3441_v49  ;;  %v1188_v40 = vrot.slane %v1180_v35, %v3441_v49  ;;  %v1179_v45 = vrot.slane %v1165_v36, %v3441_v49  ;;  %v1195_v46 = vrot.slane %v1181_v37, %v3441_v49 }
 0x3b4   : > { %v1196_v43 = vcombine.low %v1172_v38, %v1188_v40  ;;  %v1197_v44 = vcombine.high %v1172_v38, %v1188_v40  ;;  %v1198_v54 = vcombine.low %v1179_v45, %v1195_v46  ;;  %v1199_v55 = vcombine.high %v1179_v45, %v1195_v46 }
 0x3b6   : > { %v1200_v47 = vpack.c.bf16 %v1196_v43, %v1196_v43  ;;  %v1201_v48 = vpack.c.bf16 %v1197_v44, %v1197_v44  ;;  %v1202_v60 = vpack.c.bf16 %v1198_v54, %v1198_v54  ;;  %v1203_v61 = vpack.c.bf16 %v1199_v55, %v1199_v55 }
 0x3b8   : > { %v1361_v52 = vsel %vm1356_vm3, %v1200_v47, 0  ;;  %v1407_v53 = vsel %vm1356_vm3, %v1201_v48, 0  ;;  %v1453_v2 = vsel %vm1356_vm3, %v1202_v60, 0  ;;  %v1499_v3 = vsel %vm1356_vm3, %v1203_v61, 0 }
 0x3b9   : > { %2572 = vmatpush3.bf16.xpose.msra.mxu1 %v1361_v52  ;;  %2578 = vmatpush3.bf16.xpose.msra.mxu0 %v1407_v53 }
 0x3ba   : > { %2583 = vmatprep.subr.bf16.mxu1 %v2997_v17  ;;  %2589 = vmatprep.subr.bf16.mxu0 %v2997_v17 }
 0x3c0   : > { %2574 = vmatmul.mubr.msk.bf16.vlgmr.msra.gmra.mrb[4].mxu1 %vm1356_vm3, %v1048_v62  ;;  %2580 = vmatmul.mubr.msk.bf16.vlgmr.msra.gmra.mrb[0].mxu0 %vm1356_vm3, %v1049_v63 }
 0x3c1   : > { %2584 = vmatpush3.bf16.xpose.msra.mxu1 %v1453_v2  ;;  %2590 = vmatpush3.bf16.xpose.msra.mxu0 %v1499_v3 }
 0x3c2   : > { %2585 = vmatprep.mubr.msk.bf16.mxu1 %vm2998_vm1, %v2997_v17  ;;  %2591 = vmatprep.mubr.msk.bf16.mxu0 %vm2998_vm1, %v2997_v17 }
 0x3c3   : > { %2595 = vmatprep.subr.bf16.mxu1 %v2997_v17  ;;  %2601 = vmatprep.subr.bf16.mxu0 %v2997_v17 }
 0x3c8   : > { %2586 = vmatmul.mubr.msk.bf16.vlgmr.msra.gmra.mrb[8].mxu1 %vm1356_vm3, %v1050_v6  ;;  %2592 = vmatmul.mubr.msk.bf16.vlgmr.msra.gmra.mrb[4].mxu0 %vm1356_vm3, %v1051_v7 }
 0x3c9   : > { %2597 = vmatprep.mubr.msk.bf16.mxu1 %vm2998_vm1, %v2997_v17  ;;  %2603 = vmatprep.mubr.msk.bf16.mxu0 %vm2998_vm1, %v2997_v17 }
 0x493   : > { %v1397_v13 = vpop.f32.mrb[4].mxu1  ;;  %v1443_v14 = vpop.f32.mrb[0].mxu0 }
 0x494   : > { %v1398_v15 = vadd.f32 %v1397_v13, %v833_v12  ;;  %v1444_v16 = vadd.f32 %v1443_v14, %v833_v12  ;;  %v2575_v18 = vpop.f32.mrb[5].mxu1  ;;  %v2581_v20 = vpop.f32.mrb[1].mxu0 }
 0x495   : > { %v1400_v21 = vpop.f32.mrb[6].mxu1  ;;  %v1446_v22 = vpop.f32.mrb[2].mxu0 }
 0x496   : > { %v2576_v24 = vpop.f32.mrb[7].mxu1  ;;  %v2582_v25 = vpop.f32.mrb[3].mxu0  ;;  %v1544_v26 = vsel %vm1356_vm3, %v1444_v16, -inf  ;;  %v1541_v30 = vsel %vm1356_vm3, %v1398_v15, -inf }
 0x497   : > { %1545 = vmax.xlane.f32.xlu0 %v1544_v26  ;;  %1542 = vmax.xlane.f32.xlu1 %v1541_v30 }
 0x49b   : > { %v1489_v31 = vpop.f32.mrb[8].mxu1  ;;  %v1535_v32 = vpop.f32.mrb[4].mxu0 }
 0x49c   : > { %v1490_v33 = vadd.f32 %v1489_v31, %v833_v12  ;;  %v1536_v34 = vadd.f32 %v1535_v32, %v833_v12  ;;  %v2587_v35 = vpop.f32.mrb[9].mxu1  ;;  %v2593_v36 = vpop.f32.mrb[5].mxu0 }
 0x49d   : > { %v1492_v37 = vpop.f32.mrb[10].mxu1  ;;  %v1538_v38 = vpop.f32.mrb[6].mxu0 }
 0x49e   : > { %v2588_v40 = vpop.f32.mrb[11].mxu1  ;;  %v2594_v41 = vpop.f32.mrb[7].mxu0  ;;  %v1550_v42 = vsel %vm1356_vm3, %v1536_v34, -inf  ;;  %v1547_v43 = vsel %vm1356_vm3, %v1490_v33, -inf }
 0x49f   : > { %1551 = vmax.xlane.f32.xlu1 %v1550_v42  ;;  %1548 = vmax.xlane.f32.xlu0 %v1547_v43 }
 0x4b0   : > { %1206 = vrot.lane.b32.xlu1 %v3418_v27, %s3005_s25 }
 0x4b5   : > { %1204 = vrot.lane.b32.xlu0 %v3412_v23, %s3005_s25 }
 0x524   : > { %v1546_v44 = vpop.xlane.xlu0 %1545  ;;  %v1543_v45 = vpop.xlane.xlu1 %1542 }
 0x525   : > { %v1554_v46 = vsub.f32 %v1444_v16, %v1546_v44  ;;  %v1553_v47 = vsub.f32 %v1398_v15, %v1543_v45 }
 0x527   : > { %v1559_v48 = vmul.f32 1.442695, %v1554_v46  ;;  %v1557_v50 = vmul.f32 1.442695, %v1553_v47 }
 0x529   : > { %2776 = vpow2.f32 %v1559_v48 }
 0x52a   : > { %2778 = vpow2.f32 %v1557_v50 }
 0x52c   : > { %v1549_v23 = vpop.xlane.xlu0 %1548  ;;  %v1552_v54 = vpop.xlane.xlu1 %1551 }
 0x52d   : > { %v1555_v55 = vsub.f32 %v1490_v33, %v1549_v23  ;;  %v1556_v56 = vsub.f32 %v1536_v34, %v1552_v54 }
 0x52f   : > { %v1561_v57 = vmul.f32 1.442695, %v1555_v55  ;;  %v1563_v58 = vmul.f32 1.442695, %v1556_v56 }
 0x530   : > { %v1205_v62 = vpop.permute.xlu0 %1204 }
 0x531   : > { %2780 = vpow2.f32 %v1561_v57 }
 0x532   : > { %2782 = vpow2.f32 %v1563_v58 }
 0x533   : > { %v3498_v51 = vpop.eup %2776 }
 0x534   : > { %v3500_v52 = vpop.eup %2778  ;;  %v1568_v53 = vsel %vm1356_vm3, %v3498_v51, 0.0 }
 0x535   : > { %1569 = vadd.xlane.f32.xlu1 %v1568_v53  ;;  %v1565_v27 = vsel %vm1356_vm3, %v3500_v52, 0.0 }
 0x536   : > { %1566 = vadd.xlane.f32.xlu0 %v1565_v27 }
 0x53b   : > { %v3508_v59 = vpop.eup %2780 }
 0x53c   : > { %v3510_v60 = vpop.eup %2782  ;;  %v1571_v61 = vsel %vm1356_vm3, %v3508_v59, 0.0 }
 0x546   : > { %1208 = vrot.lane.b32.xlu1 %v3423_v29, %s3005_s25  ;;  %v1574_v29 = vsel %vm1356_vm3, %v3510_v60, 0.0 }
 0x54c   : > { %1210 = vrot.lane.b32.xlu0 %v3421_v28, %s3005_s25  ;;  %v1207_v28 = vpop.permute.xlu1 %1206 }
 0x56a   : > { %1572 = vadd.xlane.f32.xlu1 %v1571_v61 }
 0x56b   : > { %1575 = vadd.xlane.f32.xlu0 %v1574_v29 }
 0x5c2   : > { %v1570_v63 = vpop.xlane.xlu1 %1569 }
 0x5c3   : > { %v1567_v0 = vpop.xlane.xlu0 %1566  ;;  %2784 = vrcp.f32 %v1570_v63 }
 0x5c4   : > { %2786 = vrcp.f32 %v1567_v0 }
 0x5c6   : > { %v1209_v1 = vpop.permute.xlu1 %1208 }
 0x5c7   : > { %v1216_v2 = vcombine.low %v1205_v62, %v1209_v1  ;;  %v1217_v3 = vcombine.high %v1205_v62, %v1209_v1  ;;  %v1211_v4 = vpop.permute.xlu0 %1210  ;;  %v1778_v1 = vld [vmem:[%s3339_s13] sm:$0xf] }
 0x5c8   : > { %v1232_v5 = vcombine.low %v1207_v28, %v1211_v4  ;;  %v1233_v6 = vcombine.high %v1207_v28, %v1211_v4  ;;  %v1781_v4 = vld [vmem:[%s3339_s13 + $0xc] sm:$0xf] }
 0x5c9   : > { %v1224_v7 = vrot.slane %v1216_v2, %v3431_v39  ;;  %v1231_v8 = vrot.slane %v1217_v3, %v3431_v39  ;;  %v1779_v2 = vld [vmem:[%s3339_s13 + $0x4] sm:$0xf] }
 0x5ca   : > { %v1240_v9 = vrot.slane %v1232_v5, %v3431_v39  ;;  %v1247_v10 = vrot.slane %v1233_v6, %v3431_v39  ;;  %v1832_v3 = vsel %vm1592_vm4, %v1779_v2, 0 }
 0x5cc   : > { %v1248_v11 = vcombine.low %v1224_v7, %v1240_v9  ;;  %v1249_v12 = vcombine.high %v1224_v7, %v1240_v9  ;;  %v1264_v13 = vcombine.low %v1231_v8, %v1247_v10  ;;  %v1265_v14 = vcombine.high %v1231_v8, %v1247_v10 }
 0x5cd   : > { %v2785_v40 = vpop.eup %2784 }
 0x5ce   : > { %v1256_v15 = vrot.slane %v1248_v11, %v3441_v49  ;;  %v1263_v16 = vrot.slane %v1249_v12, %v3441_v49  ;;  %v1272_v18 = vrot.slane %v1264_v13, %v3441_v49  ;;  %v1279_v20 = vrot.slane %v1265_v14, %v3441_v49  ;;  %v2787_v43 = vpop.eup %2786 }
 0x5cf   : > { %v1581_v48 = vmul.f32 %v2787_v43, %v3500_v52  ;;  %v1924_v12 = vsel %vm1592_vm4, %v1781_v4, 0 }
 0x5d0   : > { %v1284_v21 = vcombine.low %v1256_v15, %v1263_v16  ;;  %v2490_v22 = vcombine.high %v1256_v15, %v1263_v16  ;;  %v1300_v24 = vcombine.low %v1272_v18, %v1279_v20  ;;  %v2491_v25 = vcombine.high %v1272_v18, %v1279_v20 }
 0x5d2   : > { %v1291_v26 = vrot.slane %v1284_v21, %v3431_v39  ;;  %v1299_v30 = vrot.slane %v2490_v22, %v3431_v39  ;;  %v1307_v31 = vrot.slane %v1300_v24, %v3431_v39  ;;  %v1315_v32 = vrot.slane %v2491_v25, %v3431_v39 }
 0x5d3   : > { %v1582_v39 = vmul.f32 %v2785_v40, %v3498_v51 }
 0x5d4   : > { %v1316_v33 = vcombine.low %v1291_v26, %v1299_v30  ;;  %v1317_v34 = vcombine.high %v1291_v26, %v1299_v30  ;;  %v1332_v35 = vcombine.low %v1307_v31, %v1315_v32  ;;  %v1333_v36 = vcombine.high %v1307_v31, %v1315_v32 }
 0x5d5   : > { %v1586_v56 = vpack.c.bf16 %v1582_v39, %v1582_v39 }
 0x5d6   : > { %v1324_v37 = vrot.slane %v1316_v33, %v3441_v49  ;;  %v1331_v38 = vrot.slane %v1317_v34, %v3441_v49  ;;  %v1340_v41 = vrot.slane %v1332_v35, %v3441_v49  ;;  %v1347_v42 = vrot.slane %v1333_v36, %v3441_v49 }
 0x5d7   : > { %v1585_v49 = vpack.c.bf16 %v1581_v48, %v1581_v48 }
 0x5d8   : > { %v1348_v44 = vcombine.low %v1324_v37, %v1340_v41  ;;  %v1349_v45 = vcombine.high %v1324_v37, %v1340_v41  ;;  %v1350_v46 = vcombine.low %v1331_v38, %v1347_v42  ;;  %v1351_v47 = vcombine.high %v1331_v38, %v1347_v42 }
 0x5da   : > { %v1352_v50 = vpack.c.bf16 %v1348_v44, %v1348_v44  ;;  %v1353_v53 = vpack.c.bf16 %v1349_v45, %v1349_v45  ;;  %v1354_v54 = vpack.c.bf16 %v1350_v46, %v1350_v46  ;;  %v1355_v55 = vpack.c.bf16 %v1351_v47, %v1351_v47 }
 0x5dc   : > { %v1594_v27 = vsel %vm1592_vm4, %v1352_v50, 0  ;;  %v1640_v23 = vsel %vm1592_vm4, %v1353_v53, 0  ;;  %v1686_v51 = vsel %vm1592_vm4, %v1354_v54, 0  ;;  %v1732_v52 = vsel %vm1592_vm4, %v1355_v55, 0 }
 0x5dd   : > { %2596 = vmatpush3.bf16.msra.mxu1 %v1594_v27  ;;  %2602 = vmatpush3.bf16.msra.mxu0 %v1640_v23  ;;  %v2504_v23 = vld [vmem:[%s3789_s3] ss:$0 sm:$0xff] }
 0x5de   : > { %2607 = vmatprep.subr.bf16.mxu1 %v2997_v17  ;;  %2613 = vmatprep.subr.bf16.mxu0 %v2997_v17 }
 0x5e0   : > { %2598 = vmatmul.mubr.msk.bf16.vlgmr.msra.gmra.mrb[12].mxu1 %vm1356_vm3, %v1585_v49  ;;  %2604 = vmatmul.mubr.msk.bf16.vlgmr.msra.gmra.mrb[8].mxu0 %vm1356_vm3, %v1586_v56 }
 0x5e1   : > { %2608 = vmatpush3.bf16.msra.mxu1 %v1686_v51  ;;  %2614 = vmatpush3.bf16.msra.mxu0 %v1732_v52 }
 0x5e2   : > { %2609 = vmatprep.mubr.msk.bf16.mxu1 %vm2998_vm1, %v2997_v17  ;;  %2615 = vmatprep.mubr.msk.bf16.mxu0 %vm2998_vm1, %v2997_v17 }
 0x5e3   : > { %2619 = vmatprep.subr.bf16.mxu1 %v2997_v17  ;;  %2625 = vmatprep.subr.bf16.mxu0 %v2997_v17 }
 0x5f7   : > { %v1573_v57 = vpop.xlane.xlu1 %1572 }
 0x5f8   : > { %2788 = vrcp.f32 %v1573_v57  ;;  %v1576_v58 = vpop.xlane.xlu0 %1575 }
 0x5f9   : > { %2790 = vrcp.f32 %v1576_v58 }
 0x602   : > { %v2789_v61 = vpop.eup %2788 }
 0x603   : > { %v2791_v29 = vpop.eup %2790  ;;  %v1583_v28 = vmul.f32 %v2789_v61, %v3508_v59  ;;  %v1786_v59 = vsel %vm1592_vm4, %v1778_v1, 0 }
 0x604   : > { %v1584_v62 = vmul.f32 %v2791_v29, %v3510_v60  ;;  %v1780_v60 = vld [vmem:[%s3339_s13 + $0x8] sm:$0xf] }
 0x605   : > { %v1587_v63 = vpack.c.bf16 %v1583_v28, %v1583_v28  ;;  %v1878_v11 = vsel %vm1592_vm4, %v1780_v60, 0 }
 0x606   : > { %v1588_v0 = vpack.c.bf16 %v1584_v62, %v1584_v62 }
 0x607   : > { %2610 = vmatmul.mubr.msk.bf16.vlgmr.msra.gmra.mrb[16].mxu1 %vm1356_vm3, %v1587_v63  ;;  %v2770_v63 = vld [vmem:[%s3356_s4] sm:$0xff]  }
 0x608   : > { %2616 = vmatmul.mubr.msk.bf16.vlgmr.msra.gmra.mrb[12].mxu0 %vm1356_vm3, %v1588_v0  ;;  %2621 = vmatprep.mubr.msk.bf16.mxu1 %vm2998_vm1, %v2997_v17  ;;  %v2771_v0 = vld [vmem:[%s3356_s4 + $0x8] sm:$0xff]   ;;  %s3792_s4 = sld [smem:[#allocation34_spill]] }
 0x609   : > { %2627 = vmatprep.mubr.msk.bf16.mxu0 %vm2998_vm1, %v2997_v17  ;;  %2620 = vmatpush3.bf16.msra.mxu1 %v1786_v59 }
 0x60a   : > { %2626 = vmatpush3.bf16.msra.mxu0 %v1832_v3  ;;  %2631 = vmatprep.subr.bf16.mxu1 %v2997_v17  ;;  %v2505_v3 = vld [vmem:[%s3791_s19] ss:$0 sm:$0xff] }
 0x60b   : > { %2637 = vmatprep.subr.bf16.mxu0 %v2997_v17 }
 0x60e   : > { %s3793_s6 = scalar_lea.vmem %s3792_s4, %s3324_s15 }
 0x60f   : > { %v2506_v4 = vld [vmem:[%s3793_s6] ss:$0 sm:$0xff] }
 0x6b3   : > { %v1630_v5 = vpop.f32.mrb[12].mxu1  ;;  %v1676_v6 = vpop.f32.mrb[8].mxu0 }
 0x6b4   : > { %v1774_v7 = vpack.c.bf16 %v1630_v5, %v1630_v5  ;;  %v1775_v8 = vpack.c.bf16 %v1676_v6, %v1676_v6  ;;  %v2599_v9 = vpop.f32.mrb[13].mxu1  ;;  %v2605_v10 = vpop.f32.mrb[9].mxu0 }
 0x6b5   : > { %v1633_v13 = vpop.f32.mrb[14].mxu1  ;;  %v1679_v14 = vpop.f32.mrb[10].mxu0  ;;  %v2773_v9 = vld [vmem:[%s3366_s0 + $0x8] sm:$0xff]   ;;  %v2774_v10 = vld [vmem:[%s3366_s0 + $0x10] sm:$0xff]  }
 0x6b6   : > { %v2600_v15 = vpop.f32.mrb[15].mxu1  ;;  %v2606_v16 = vpop.f32.mrb[11].mxu0  ;;  %2622 = vmatmul.mubr.msk.bf16.vlgmr.msra.gmra.mrb[20].mxu1 %vm1356_vm3, %v1774_v7  ;;  %2628 = vmatmul.mubr.msk.bf16.vlgmr.msra.gmra.mrb[16].mxu0 %vm1356_vm3, %v1775_v8  ;;  %v2772_v8 = vld [vmem:[%s3366_s0] sm:$0xff]  }
 0x6b7   : > { %2632 = vmatpush3.bf16.msra.mxu1 %v1878_v11  ;;  %2638 = vmatpush3.bf16.msra.mxu0 %v1924_v12  ;;  %v2775_v11 = vld [vmem:[%s3366_s0 + $0x18] sm:$0xff]   ;;  %v2507_v12 = vld [vmem:[%s775_s22] ss:$0 sm:$0xff] }
 0x6b8   : > { %2633 = vmatprep.mubr.msk.bf16.mxu1 %vm2998_vm1, %v2997_v17  ;;  %2639 = vmatprep.mubr.msk.bf16.mxu0 %vm2998_vm1, %v2997_v17 }
 0x6b9   : > { %2643 = vmatprep.subr.bf16.mxu1 %v2997_v17  ;;  %2651 = vmatprep.subr.bf16.mxu0 %v2997_v17 }
 0x6da   : > { %v1722_v18 = vpop.f32.mrb[16].mxu1 }
 0x6db   : > { %v1776_v20 = vpack.c.bf16 %v1722_v18, %v1722_v18  ;;  %v1768_v21 = vpop.f32.mrb[12].mxu0  ;;  %v2611_v22 = vpop.f32.mrb[17].mxu1 }
 0x6dc   : > { %v1777_v24 = vpack.c.bf16 %v1768_v21, %v1768_v21  ;;  %v2617_v25 = vpop.f32.mrb[13].mxu0  ;;  %v1725_v26 = vpop.f32.mrb[18].mxu1 }
 0x6dd   : > { %v1771_v30 = vpop.f32.mrb[14].mxu0  ;;  %v2612_v31 = vpop.f32.mrb[19].mxu1  ;;  %2634 = vmatmul.mubr.msk.bf16.vlgmr.msra.gmra.mrb[24].mxu1 %vm1356_vm3, %v1776_v20 }
 0x6de   : > { %v2618_v32 = vpop.f32.mrb[15].mxu0  ;;  %2640 = vmatmul.mubr.msk.bf16.vlgmr.msra.gmra.mrb[20].mxu0 %vm1356_vm3, %v1777_v24  ;;  %2647 = vmatprep.mubr.msk.bf16.mxu1 %vm2998_vm1, %v2997_v17 }
 0x6df   : > { %2659 = vmatprep.mubr.msk.bf16.mxu0 %vm2998_vm1, %v2997_v17  ;;  %2644 = vmatpush3.bf16.msra.mxu1 %v2770_v63 }
 0x6e0   : > { %2645 = vmatprep.subr.bf16.mxu1 %v2997_v17  ;;  %2652 = vmatpush3.bf16.msra.mxu0 %v2772_v8 }
 0x6e1   : > { %2653 = vmatprep.subr.bf16.mxu0 %v2997_v17 }
 0x6e3   : > { %2646 = vmatpush3.bf16.msra.mxu1 %v2771_v0 }
 0x6e4   : > { %2654 = vmatpush3.bf16.msra.mxu0 %v2773_v9 }
 0x6e5   : > { %2655 = vmatprep.subr.bf16.mxu0 %v2997_v17 }
 0x6e8   : > { %2656 = vmatpush3.bf16.msra.mxu0 %v2774_v10 }
 0x6e9   : > { %2657 = vmatprep.subr.bf16.mxu0 %v2997_v17 }
 0x6ec   : > { %2658 = vmatpush3.bf16.msra.mxu0 %v2775_v11 }
 0x789   : > { %v1822_v33 = vpop.f32.mrb[20].mxu1  ;;  %v1868_v34 = vpop.f32.mrb[16].mxu0 }
 0x78a   : > { %v1966_v35 = vsel %vm858_vm2, %v1822_v33, 0.0  ;;  %v1967_v36 = vsel %vm858_vm2, %v1868_v34, 0.0  ;;  %v2623_v37 = vpop.f32.mrb[21].mxu1  ;;  %v2629_v38 = vpop.f32.mrb[17].mxu0  ;;  %v2511_v33 = vld [vmem:[%s783_s29] ss:$0 sm:$0xff] }
 0x78b   : > { %v1968_v40 = vadd.f32 %v1967_v36, %v1966_v35  ;;  %v1825_v41 = vpop.f32.mrb[22].mxu1  ;;  %v1871_v42 = vpop.f32.mrb[18].mxu0 }
 0x78c   : > { %v2624_v43 = vpop.f32.mrb[23].mxu1  ;;  %v2630_v44 = vpop.f32.mrb[19].mxu0 }
 0x7b0   : > { %v1914_v45 = vpop.f32.mrb[24].mxu1 }
 0x7b1   : > { %v1969_v46 = vsel %vm858_vm2, %v1914_v45, 0.0  ;;  %v1960_v47 = vpop.f32.mrb[20].mxu0  ;;  %v2635_v39 = vpop.f32.mrb[25].mxu1 }
 0x7b2   : > { %v1970_v48 = vadd.f32 %v1969_v46, %v1968_v40  ;;  %v2641_v50 = vpop.f32.mrb[21].mxu0  ;;  %v1917_v53 = vpop.f32.mrb[26].mxu1  ;;  %v1971_v27 = vsel %vm858_vm2, %v1960_v47, 0.0 }
 0x7b3   : > { %v1963_v54 = vpop.f32.mrb[22].mxu0  ;;  %v2636_v55 = vpop.f32.mrb[27].mxu1  ;;  %v2517_v53 = vld [vmem:[%s786_s16] ss:$0 sm:$0xff] }
 0x7b4   : > { %v1972_v49 = vadd.f32 %v1971_v27, %v1970_v48  ;;  %v2642_v56 = vpop.f32.mrb[23].mxu0 }
 0x7b6   : > { %v1980_v51 = vadd.f32 %v2504_v23, %v1972_v49  ;;  %v2518_v23 = vld [vmem:[%s789_s8] ss:$0 sm:$0xff] }
 0x7b8   : > { %v1981_v52 = vadd.f32 %v1980_v51, %v3396_v19 }
 0x7ba   : > { %v1984_v57 = vsel %vm858_vm2, %v1981_v52, 0.0 }
 0x7bb   : > { %1985 = vadd.xlane.f32.xlu0 %v1984_v57 }
 0x848   : > { %v1986_v58 = vpop.xlane.xlu0 %1985 }
 0x849   : > { %v1988_v61 = vmul.f32 0.03125, %v1986_v58 }
 0x84b   : > { %v1989_v29 = vsub.f32 %v1981_v52, %v1988_v61 }
 0x84d   : > { %v1990_v28 = vmul.f32 %v1989_v29, %v1989_v29 }
 0x84f   : > { %v1991_v62 = vsel %vm858_vm2, %v1990_v28, 0.0 }
 0x850   : > { %1992 = vadd.xlane.f32.xlu1 %v1991_v62 }
 0x8dd   : > { %v1993_v19 = vpop.xlane.xlu1 %1992 }
 0x8de   : > { %v1994_v1 = vmul.f32 0.03125, %v1993_v19 }
 0x8e0   : > { %v1995_v2 = vadd.f32 1e-12, %v1994_v1 }
 0x8e2   : > { %2792 = vrsqrt.f32 %v1995_v2 }
 0x8ec   : > { %v2793_v59 = vpop.eup %2792 }
 0x8ed   : > { %v1997_v60 = vmul.f32 %v2793_v59, %v1989_v29 }
 0x8ef   : > { %v2004_v5 = vmul.f32 %v2505_v3, %v1997_v60 }
 0x8f1   : > { %v2011_v6 = vadd.f32 %v2506_v4, %v2004_v5 }
 0x8f3   : > { %v2016_v7 = vpack.c.bf16 %v2011_v6, %v2011_v6 }
 0x8f5   : > { %2648 = vmatmul.mubr.msk.bf16.vlgmr.msra.gmra.mrb[28].mxu1 %vm858_vm2, %v2016_v7 }
 0x9c8   : > { %v2073_v13 = vpop.f32.mrb[28].mxu1 }
 0x9c9   : > { %v2074_v14 = vadd.f32 %v2507_v12, %v2073_v13  ;;  %v2649_v15 = vpop.f32.mrb[29].mxu1 }
 0x9ca   : > { %v2076_v16 = vpop.f32.mrb[30].mxu1 }
 0x9cb   : > { %v2079_v18 = vmul.f32 %v2074_v14, %v2074_v14  ;;  %v2650_v20 = vpop.f32.mrb[31].mxu1 }
 0x9cd   : > { %v2080_v21 = vmul.f32 %v2079_v18, %v2074_v14 }
 0x9cf   : > { %v2081_v22 = vmul.f32 0.044715, %v2080_v21 }
 0x9d1   : > { %v2082_v24 = vadd.f32 %v2081_v22, %v2074_v14 }
 0x9d3   : > { %v2083_v25 = vmul.f32 0.7978846, %v2082_v24 }
 0x9d5   : > { %2794 = vtanh.f32 %v2083_v25 }
 0x9df   : > { %v2795_v17 = vpop.eup %2794 }
 0x9e0   : > { %v2085_v26 = vadd.f32 1.0, %v2795_v17 }
 0x9e2   : > { %v2086_v30 = vmul.f32 0.5, %v2085_v26 }
 0x9e4   : > { %v2087_v31 = vmul.f32 %v2086_v30, %v2074_v14 }
 0x9e6   : > { %v2096_v32 = vpack.c.bf16 %v2087_v31, %v2087_v31 }
 0x9e8   : > { %2660 = vmatmul.mubr.msk.bf16.vlgmr.msra.gmra.mrb[24].mxu0 %vm2128_vm5, %v2096_v32 }
 0xabb   : > { %v2166_v34 = vpop.f32.mrb[24].mxu0 }
 0xabc   : > { %v2167_v35 = vadd.f32 %v2511_v33, %v2166_v34  ;;  %v2661_v36 = vpop.f32.mrb[25].mxu0 }
 0xabd   : > { %v2169_v37 = vpop.f32.mrb[26].mxu0 }
 0xabe   : > { %v2662_v38 = vpop.f32.mrb[27].mxu0  ;;  %v2172_v40 = vadd.f32 %v2167_v35, %v2011_v6 }
 0xac0   : > { %v2175_v41 = vsel %vm858_vm2, %v2172_v40, 0.0 }
 0xac1   : > { %2176 = vadd.xlane.f32.xlu0 %v2175_v41 }
 0xb4e   : > { %v2177_v42 = vpop.xlane.xlu0 %2176 }
 0xb4f   : > { %v2178_v43 = vmul.f32 0.03125, %v2177_v42 }
 0xb51   : > { %v2179_v44 = vsub.f32 %v2172_v40, %v2178_v43 }
 0xb53   : > { %v2180_v45 = vmul.f32 %v2179_v44, %v2179_v44 }
 0xb55   : > { %v2181_v46 = vsel %vm858_vm2, %v2180_v45, 0.0 }
 0xb56   : > { %2182 = vadd.xlane.f32.xlu1 %v2181_v46 }
 0xbe3   : > { %v2183_v47 = vpop.xlane.xlu1 %2182 }
 0xbe4   : > { %v2184_v39 = vmul.f32 0.03125, %v2183_v47 }
 0xbe6   : > { %v2185_v48 = vadd.f32 1e-12, %v2184_v39 }
 0xbe8   : > { %2796 = vrsqrt.f32 %v2185_v48 }
 0xbf2   : > { %v2797_v50 = vpop.eup %2796 }
 0xbf3   : > { %v2187_v27 = vmul.f32 %v2797_v50, %v2179_v44  ;;  %2206 = sbr.rel (%p2519_p1) target bundleno = 3068 (0xbfc), region = 104 }
 0xbf5   : > { %v2194_v54 = vmul.f32 %v2517_v53, %v2187_v27 }
 0xbf7   : > { %v2201_v55 = vadd.f32 %v2518_v23, %v2194_v54 }
 0xbf9   : > { %2202 = vst.msk [vmem:[#allocation2] sm:$0xff] %vm858_vm2, %v2201_v55  ;;  %v2207_v49 = vpack.c.bf16 (!%p2519_p1), %v2201_v55, %v2201_v55 }
 0xbfb   : > { %2209 = vst.msk [vmem:[%s3380_s18] sm:$0xf] %vm2208_vm6, %v2207_v49 }
 0xbfc PF: > { %s3798_s25 = sld [smem:[#allocation17_spill]]  ;;  %s3799_s16 = sld [smem:[#allocation26_spill]] }
 0xbfd   : > { %s3800_s13 = sld [smem:[#allocation21_spill]]  ;;  %s3801_s8 = sld [smem:[#allocation41_spill]] }
 0xbfe   : > { %s2224_s1 = sshll.u32 %s3380_s18, 4  ;;  %s3006_s19 = smov [#allocation9]   ;;  %s2225_s1 = int_to_ptr.vmem [resolvable:$true] %s2224_s1 }
 0xbff   : > { %s2886_s24 = scalar_lea.vmem %s2225_s1, 64  ;;  %s2890_s17 = sshll.u32 %s3006_s19, 4  ;;  %s2891_s17 = int_to_ptr.vmem [resolvable:$false] %s2890_s17 }
 0xc00   : > { %p2887_p4 = scmp.ne.s32.totalorder %s2225_s1, %s2886_s24  ;;  %s2892_s14 = scalar_lea.vmem %s2891_s17, 128 }
 0xc01   : > { %p2893_p0 = scmp.lt.s32.totalorder %s2225_s1, %s2891_s17  ;;  %p2894_p5 = scmp.lt.s32.totalorder %s2892_s14, %s2886_s24 }
 0xc02   : > { %s2521_s11 = sshll.u32 %s3798_s25, 6  ;;  %s2211_s27 = scalar_lea.sflag [#allocation5], %s3799_s16 }
 0xc03   : > { %s3642_s20 = scalar_lea.hbm %s3801_s8, %s2521_s11  ;;  %p3802_p9 = scmp.ne.s32.totalorder %s3800_s13, 0 }
 0xc04   : > { %p2895_p7 = por %p2894_p5, %p2893_p0 }
 0xc05   : > { %p2888_p11 = pnand %p2887_p4, %p3802_p9 }
 0xc07   : > { %p2889_p6 = pneg %p2888_p11 }
 0xc09   : > { %p2896_p2 = pnand %p2895_p7, %p2889_p6 }
 0xc0b   : > { %2899 = shalt.err (!%p2896_p2)
}
 0xc0c   : > { %s2900_s18 = scalar_lea.hbm %s3642_s20, 64  ;;  %s2904_s9 = scalar_lea.hbm %s3801_s8, 128 }
 0xc0d   : > { %p2901_p3 = scmp.ne.s32.totalorder %s3642_s20, %s2900_s18  ;;  %p2905_p10 = scmp.lt.u32.totalorder %s3642_s20, %s3801_s8 }
 0xc0e   : > { %p2906_p12 = scmp.lt.u32.totalorder %s2904_s9, %s2900_s18  ;;  %p2908_p4 = scmp.lt.u32.totalorder %s2900_s18, %s3642_s20 }
 0xc0f   : > { %p2902_p13 = pnand %p2901_p3, %p3802_p9 }
 0xc10   : > { %p2907_p1 = por %p2906_p12, %p2905_p10 }
 0xc11   : > { %p2903_p8 = pneg %p2902_p13 }
 0xc12   : > { %p2909_p11 = por %p2908_p4, %p2907_p1 }
 0xc14   : > { %p2910_p6 = pnand %p2909_p11, %p2903_p8 }
 0xc16   : > { %2913 = shalt.err (!%p2910_p6)
}
 0xc17   : > { %2671 = dma.vmem_to_hbm [thread:$0]  (%p3802_p9), %s2225_s1, 64, %s3642_s20, %s2211_s27  }
 0xc18 PF: > { %s3803_s22 = sld [smem:[#allocation20_spill]]  ;;  %s3804_s0 = sld [smem:[#allocation14_spill]] }
 0xc19   : > { %s3805_s28 = sld [smem:[#allocation22_spill]] }
 0xc1e   : > { %p2691_p0 = scmp.ge.s32.totalorder %s3803_s22, 2  ;;  %s2236_s29 = sand.u32 1, %s3804_s0  }
 0xc1f   : > { %p3806_p5 = scmp.ne.s32.totalorder %s3805_s28, 0  ;;  %s2237_s2 = scalar_lea.sflag [#allocation5], %s2236_s29 }
 0xc21   : > { %p2685_p7 = pnand %p2691_p0, %p3806_p5 }
 0xc23   : > { %2959 = dma.done.wait (!%p2685_p7), %s2237_s2, 64  }
 0xc24   : > { %2961 = vsyncadd (!%p2685_p7), %s2237_s2, 4294967232  ;;  %s35_s28 = sadd.s32 1, %s3803_s22   ;;  %s3807_s21 = sld [smem:[#allocation15_spill]] }
 0xc25   : > { %p32_p2 = scmp.ge.s32.totalorder %s35_s28, 6   ;;  %s3808_s22 = sld [smem:[#allocation16_spill]] }
 0xc26   : > { %s3809_s23 = sld [smem:[#allocation25_spill]]  ;;  %s3810_s24 = sld [smem:[#allocation18_spill]] }
 0xc27   : > { %s3811_s25 = sld [smem:[#allocation19_spill]]  ;;  %s3812_s26 = sld [smem:[#allocation23_spill]] }
 0xc28   : > { %s3813_s27 = sld [smem:[#allocation24_spill]]  ;;  %34 = sbr.rel (!%p32_p2) target bundleno = 25 (0x19), region = 190 }
 0xc2f   :  { %2242 = vsyncpa [#allocation4], 1 }
 0xc30   :  { %2244 = vsyncpa [#allocation4 + $0x1], 1 }
 0xc31   :  { %2245 = vsyncpa [#allocation7], 1 }
 0xc32   :  { %2247 = vsyncpa [#allocation7 + $0x1], 1 }
 0xc33   :  { %2248 = vsyncpa [#allocation5], 1 }
 0xc34   :  { %2250 = vsyncpa [#allocation5 + $0x1], 1 }

</bundles_post_ra>
